<compile_context>
chip_gen: v6e
topology: v6e:2x2x1
jax: 0.10.0
libtpu: 0.0.40
codegen_flags: <defaults>
</compile_context>

<pallas_src>
import functools

import jax
import jax.numpy as jnp
from jax import lax
from jax.experimental import pallas as pl
from jax.experimental.pallas import tpu as pltpu

EPS = 1e-5  # EquivariantLayerNormV2 default
_HIGHEST = lax.Precision.HIGHEST


def _fctp_proj_norm_kernel(x_ref, a_ref, s_ref, w_ref, e_ref, c_ref, b_ref, o_ref):
    """One tile of packed rows: [R, P*C] -> [R, P*O] (all lane-dense)."""
    xp = x_ref[...].astype(jnp.float32)          # [R, P*C] packed node features
    seg = s_ref[...]                             # [P*C, P*C] block-diag 1/C matrix

    # ---- equivariant layer norm (scalar irreps == LayerNorm over channels) ----
    mean = jnp.dot(xp, seg, preferred_element_type=jnp.float32, precision=_HIGHEST)
    xc = xp - mean
    var = jnp.dot(xc * xc, seg, preferred_element_type=jnp.float32, precision=_HIGHEST)
    xn = xc * lax.rsqrt(var + EPS)               # LN affine folded into w_ref / c_ref

    # ---- fully connected tensor product (x_norm (x) attr) -> output + bias ----
    u = jnp.dot(xn, w_ref[...], preferred_element_type=jnp.float32, precision=_HIGHEST)
    a = jnp.dot(a_ref[...], e_ref[...], preferred_element_type=jnp.float32)  # attr bcast
    y = a * (u + c_ref[...]) + b_ref[...]
    o_ref[...] = y.astype(o_ref.dtype)


@functools.partial(jax.jit, static_argnames=("block_rows",))
def fctp_projection_norm(x, node_attr, ln_w, ln_b, w, b, *, block_rows=512):
    """FCTPProjectionNorm forward for scalar-only irreps.

    x         : [N, C]      node features ("Cx0e"), float32 or bfloat16
    node_attr : [N] / [N,1] scalar node attribute ("1x0e")
    ln_w, ln_b: [C]         EquivariantLayerNormV2 affine weight / bias
    w         : [C, O]      FullyConnectedTensorProductRescale weights (rescale absorbed)
    b         : [O]         bias
    returns   : [N, O]      in x.dtype
    """
    N, C = x.shape
    O = w.shape[-1]
    if 128 % C != 0 or ((128 // C) * O) % 128 != 0:
        # TODO(synk): general channel counts that don't pack into 128 lanes need a
        # fallback [tile_n, C] layout; not required for the 32x0e instantiation.
        raise NotImplementedError("packed layout needs C | 128 and C | O")
    P = 128 // C
    out_dtype = x.dtype
    f32 = jnp.float32

    # ---- host-side parameter prep (tiny, folded once under jit) ----
    w32 = w.astype(f32)
    w_fold = ln_w.astype(f32).reshape(C, 1) * w32                   # fold LN weight
    c_vec = ln_b.astype(f32).reshape(1, C) @ w32                    # LN bias through TP
    eye_p = jnp.eye(P, dtype=f32)
    w_blk = jnp.kron(eye_p, w_fold)                                 # [P*C, P*O]
    seg_mean = jnp.kron(eye_p, jnp.full((C, C), 1.0 / C, f32))      # [P*C, P*C]
    attr_bc = jnp.kron(eye_p, jnp.ones((1, O), f32))                # [P, P*O]
    c_pk = jnp.tile(c_vec, (1, P))                                  # [1, P*O]
    b_pk = jnp.tile(b.astype(f32).reshape(1, O), (1, P))            # [1, P*O]

    # ---- pack P nodes per 128-lane row (free reshape) + pad to whole tiles ----
    a = node_attr.reshape(-1).astype(f32)
    rows = pl.cdiv(N, P)
    blk = max(16, min(block_rows, rows))
    blk = ((blk + 15) // 16) * 16                 # sublane-friendly for f32 and bf16
    rows_pad = ((rows + blk - 1) // blk) * blk
    n_pad = rows_pad * P
    if n_pad != N:
        x = jnp.pad(x, ((0, n_pad - N), (0, 0)))
        a = jnp.pad(a, (0, n_pad - N), constant_values=1.0)
    xp = x.reshape(rows_pad, P * C)
    ap = a.reshape(rows_pad, P)

    grid = (rows_pad // blk,)
    y = pl.pallas_call(
        _fctp_proj_norm_kernel,
        out_shape=jax.ShapeDtypeStruct((rows_pad, P * O), out_dtype),
        grid_spec=pltpu.PrefetchScalarGridSpec(
            num_scalar_prefetch=0,
            grid=grid,
            in_specs=[
                pl.BlockSpec((blk, P * C), lambda i: (i, 0)),       # packed x tile
                pl.BlockSpec((blk, P), lambda i: (i, 0)),           # packed node attr
                pl.BlockSpec((P * C, P * C), lambda i: (0, 0)),     # segment-mean matrix
                pl.BlockSpec((P * C, P * O), lambda i: (0, 0)),     # block-diag weights
                pl.BlockSpec((P, P * O), lambda i: (0, 0)),         # attr broadcast matrix
                pl.BlockSpec((1, P * O), lambda i: (0, 0)),         # (ln_b @ W), attr-scaled
                pl.BlockSpec((1, P * O), lambda i: (0, 0)),         # bias
            ],
            out_specs=pl.BlockSpec((blk, P * O), lambda i: (i, 0)),
        ),
        compiler_params=pltpu.CompilerParams(
            dimension_semantics=("parallel",)),
    )(xp, ap, seg_mean, w_blk, attr_bc, c_pk, b_pk)

    return y.reshape(rows_pad * P, O)[:N]


def _reference(x, node_attr, ln_w, ln_b, w, b):
    x = x.astype(jnp.float32)
    a = node_attr.reshape(-1, 1).astype(jnp.float32)
    mean = jnp.mean(x, axis=-1, keepdims=True)
    xc = x - mean
    var = jnp.mean(xc * xc, axis=-1, keepdims=True)
    xn = xc * lax.rsqrt(var + EPS) * ln_w.reshape(1, -1) + ln_b.reshape(1, -1)
    return jnp.dot(xn * a, w.astype(jnp.float32), precision=_HIGHEST) + b.reshape(1, -1)


if __name__ == "__main__":
    N, C, O = 256, 32, 32     # "32x0e" in/out, "1x0e" node attr
    key = jax.random.PRNGKey(0)
    kx, ka, klw, klb, kw, kb = jax.random.split(key, 6)

    x = jax.random.normal(kx, (N, C), dtype=jnp.float32)
    # "1x0e" node attribute (typically all-ones in Equiformer); random here so the
    # tensor-product path is actually exercised.
    attr = jax.random.uniform(ka, (N, 1), minval=0.5, maxval=1.5, dtype=jnp.float32)
    ln_w = 1.0 + 0.1 * jax.random.normal(klw, (C,), dtype=jnp.float32)
    ln_b = 0.1 * jax.random.normal(klb, (C,), dtype=jnp.float32)
    w = jax.random.normal(kw, (C, O), dtype=jnp.float32) / jnp.sqrt(C)
    b = 0.01 * jax.random.normal(kb, (O,), dtype=jnp.float32)

    ref = _reference(x, attr, ln_w, ln_b, w, b)

    # float32, multi-step grid (block_rows=16 packed rows = 64 nodes per grid step)
    out = jax.block_until_ready(
        fctp_projection_norm(x, attr, ln_w, ln_b, w, b, block_rows=16))
    assert out.shape == (N, O)
    assert jnp.allclose(out, ref, atol=2e-4, rtol=2e-4), "f32 mismatch vs reference"

    # ragged N (exercises the wrapper-side padding path)
    N2 = 250
    out2 = jax.block_until_ready(
        fctp_projection_norm(x[:N2], attr[:N2], ln_w, ln_b, w, b, block_rows=16))
    assert out2.shape == (N2, O)
    assert jnp.allclose(out2, ref[:N2], atol=2e-4, rtol=2e-4), "ragged-N mismatch"

    # bf16 storage for x / out (halves HBM traffic on v6e/v7x); math stays float32
    x_bf = x.astype(jnp.bfloat16)
    out_bf = jax.block_until_ready(
        fctp_projection_norm(x_bf, attr, ln_w, ln_b, w, b, block_rows=16))
    ref_bf = _reference(x_bf.astype(jnp.float32), attr, ln_w, ln_b, w, b)
    assert out_bf.dtype == jnp.bfloat16
    assert jnp.allclose(out_bf.astype(jnp.float32), ref_bf,
                        atol=5e-2, rtol=2e-2), "bf16 mismatch vs reference"

    print("KERNEL_OK")
</pallas_src>

<mosaic_0001>
module attributes {stable_mosaic.version = 11 : i64} {
  func.func @_fctp_proj_norm_kernel(%arg0: i32, %arg1: memref<16x128xf32, #tpu.memory_space<vmem>>, %arg2: memref<16x4xf32, #tpu.memory_space<vmem>>, %arg3: memref<128x128xf32, #tpu.memory_space<vmem>>, %arg4: memref<128x128xf32, #tpu.memory_space<vmem>>, %arg5: memref<4x128xf32, #tpu.memory_space<vmem>>, %arg6: memref<1x128xf32, #tpu.memory_space<vmem>>, %arg7: memref<1x128xf32, #tpu.memory_space<vmem>>, %arg8: memref<16x128xf32, #tpu.memory_space<vmem>>) attributes {dimension_semantics = [#tpu.dimension_semantics<parallel>], iteration_bounds = array<i64: 4>, scalar_prefetch = 0 : i64, scratch_operands = 0 : i64, tpu.core_type = #tpu.core_type<tc>, window_params = [{transform_indices = @transform_0, window_bounds = array<i64: 16, 128>}, {transform_indices = @transform_1, window_bounds = array<i64: 16, 4>}, {pipeline_mode = #tpu.pipeline_mode<synchronous>, transform_indices = @transform_2, window_bounds = array<i64: 128, 128>}, {pipeline_mode = #tpu.pipeline_mode<synchronous>, transform_indices = @transform_3, window_bounds = array<i64: 128, 128>}, {pipeline_mode = #tpu.pipeline_mode<synchronous>, transform_indices = @transform_4, window_bounds = array<i64: 4, 128>}, {pipeline_mode = #tpu.pipeline_mode<synchronous>, transform_indices = @transform_5, window_bounds = array<i64: 1, 128>}, {pipeline_mode = #tpu.pipeline_mode<synchronous>, transform_indices = @transform_6, window_bounds = array<i64: 1, 128>}, {transform_indices = @transform_7, window_bounds = array<i64: 16, 128>}]} {
    %c0 = arith.constant 0 : index
    %c0_0 = arith.constant 0 : index
    %0 = vector.load %arg1[%c0, %c0_0] : memref<16x128xf32, #tpu.memory_space<vmem>>, vector<16x128xf32>
    %c0_1 = arith.constant 0 : index
    %c0_2 = arith.constant 0 : index
    %1 = vector.load %arg3[%c0_1, %c0_2] : memref<128x128xf32, #tpu.memory_space<vmem>>, vector<128x128xf32>
    %cst = arith.constant dense<0.000000e+00> : vector<16x128xf32>
    %2 = tpu.matmul %0, %1, %cst {dimension_numbers = #tpu.dot_dimension_numbers<[1], [0], [0], [1], [0, 0, 1, 1], [], []>, precision = #tpu.contract_precision<fp32>} : vector<16x128xf32>, vector<128x128xf32>, vector<16x128xf32> -> vector<16x128xf32>
    %3 = arith.subf %0, %2 : vector<16x128xf32>
    %4 = arith.mulf %3, %3 : vector<16x128xf32>
    %cst_3 = arith.constant dense<0.000000e+00> : vector<16x128xf32>
    %5 = tpu.matmul %4, %1, %cst_3 {dimension_numbers = #tpu.dot_dimension_numbers<[1], [0], [0], [1], [0, 0, 1, 1], [], []>, precision = #tpu.contract_precision<fp32>} : vector<16x128xf32>, vector<128x128xf32>, vector<16x128xf32> -> vector<16x128xf32>
    %cst_4 = arith.constant 9.99999974E-6 : f32
    %6 = vector.broadcast %cst_4 : f32 to vector<16x128xf32>
    %7 = arith.addf %5, %6 : vector<16x128xf32>
    %8 = math.rsqrt %7 : vector<16x128xf32>
    %9 = arith.mulf %3, %8 : vector<16x128xf32>
    %c0_5 = arith.constant 0 : index
    %c0_6 = arith.constant 0 : index
    %10 = vector.load %arg4[%c0_5, %c0_6] : memref<128x128xf32, #tpu.memory_space<vmem>>, vector<128x128xf32>
    %cst_7 = arith.constant dense<0.000000e+00> : vector<16x128xf32>
    %11 = tpu.matmul %9, %10, %cst_7 {dimension_numbers = #tpu.dot_dimension_numbers<[1], [0], [0], [1], [0, 0, 1, 1], [], []>, precision = #tpu.contract_precision<fp32>} : vector<16x128xf32>, vector<128x128xf32>, vector<16x128xf32> -> vector<16x128xf32>
    %c0_8 = arith.constant 0 : index
    %c0_9 = arith.constant 0 : index
    %12 = vector.load %arg2[%c0_8, %c0_9] : memref<16x4xf32, #tpu.memory_space<vmem>>, vector<16x4xf32>
    %c0_10 = arith.constant 0 : index
    %c0_11 = arith.constant 0 : index
    %13 = vector.load %arg5[%c0_10, %c0_11] : memref<4x128xf32, #tpu.memory_space<vmem>>, vector<4x128xf32>
    %cst_12 = arith.constant dense<0.000000e+00> : vector<16x128xf32>
    %14 = tpu.matmul %12, %13, %cst_12 {dimension_numbers = #tpu.dot_dimension_numbers<[1], [0], [0], [1], [0, 0, 1, 1], [], []>} : vector<16x4xf32>, vector<4x128xf32>, vector<16x128xf32> -> vector<16x128xf32>
    %c0_13 = arith.constant 0 : index
    %c0_14 = arith.constant 0 : index
    %15 = vector.load %arg6[%c0_13, %c0_14] : memref<1x128xf32, #tpu.memory_space<vmem>>, vector<1x128xf32>
    %16 = vector.broadcast %15 : vector<1x128xf32> to vector<16x128xf32>
    %17 = arith.addf %11, %16 : vector<16x128xf32>
    %18 = arith.mulf %14, %17 : vector<16x128xf32>
    %c0_15 = arith.constant 0 : index
    %c0_16 = arith.constant 0 : index
    %19 = vector.load %arg7[%c0_15, %c0_16] : memref<1x128xf32, #tpu.memory_space<vmem>>, vector<1x128xf32>
    %20 = vector.broadcast %19 : vector<1x128xf32> to vector<16x128xf32>
    %21 = arith.addf %18, %20 : vector<16x128xf32>
    %c0_17 = arith.constant 0 : index
    %c0_18 = arith.constant 0 : index
    %22 = vector.load %arg8[%c0_17, %c0_18] : memref<16x128xf32, #tpu.memory_space<vmem>>, vector<16x128xf32>
    tpu.vector_store %arg8[%c0_17, %c0_18], %21 {strides = array<i32>} : memref<16x128xf32, #tpu.memory_space<vmem>>, vector<16x128xf32>,
    return
  }
  func.func @transform_0(%arg0: i32) -> (i32, i32) {
    %c0_i32 = arith.constant 0 : i32
    %c0_i32_0 = arith.constant 0 : i32
    return %arg0, %c0_i32 : i32, i32
  }
  func.func @transform_1(%arg0: i32) -> (i32, i32) {
    %c0_i32 = arith.constant 0 : i32
    %c0_i32_0 = arith.constant 0 : i32
    return %arg0, %c0_i32 : i32, i32
  }
  func.func @transform_2(%arg0: i32) -> (i32, i32) {
    %c0_i32 = arith.constant 0 : i32
    %c0_i32_0 = arith.constant 0 : i32
    %c0_i32_1 = arith.constant 0 : i32
    return %c0_i32, %c0_i32_0 : i32, i32
  }
  func.func @transform_3(%arg0: i32) -> (i32, i32) {
    %c0_i32 = arith.constant 0 : i32
    %c0_i32_0 = arith.constant 0 : i32
    %c0_i32_1 = arith.constant 0 : i32
    return %c0_i32, %c0_i32_0 : i32, i32
  }
  func.func @transform_4(%arg0: i32) -> (i32, i32) {
    %c0_i32 = arith.constant 0 : i32
    %c0_i32_0 = arith.constant 0 : i32
    %c0_i32_1 = arith.constant 0 : i32
    return %c0_i32, %c0_i32_0 : i32, i32
  }
  func.func @transform_5(%arg0: i32) -> (i32, i32) {
    %c0_i32 = arith.constant 0 : i32
    %c0_i32_0 = arith.constant 0 : i32
    %c0_i32_1 = arith.constant 0 : i32
    return %c0_i32, %c0_i32_0 : i32, i32
  }
  func.func @transform_6(%arg0: i32) -> (i32, i32) {
    %c0_i32 = arith.constant 0 : i32
    %c0_i32_0 = arith.constant 0 : i32
    %c0_i32_1 = arith.constant 0 : i32
    return %c0_i32, %c0_i32_0 : i32, i32
  }
  func.func @transform_7(%arg0: i32) -> (i32, i32) {
    %c0_i32 = arith.constant 0 : i32
    %c0_i32_0 = arith.constant 0 : i32
    return %arg0, %c0_i32 : i32, i32
  }
}

</mosaic_0001>

<bundles_post_ra>
// kernel: fctp_projection_norm.1
= control target key start
LH: loop header
LB: loop body
LE: loop exit
PB: predicated region body
PF: predicated region fallthrough
CT: control target
= control target key end

     0   :  { %s3615_s24 = smov 0   ;;  %s4733_s0 = inlined_call_operand.vmem [shape: f32[64,128], index: 0, kind: input, shape index: {}]   ;;  %s4734_s1 = inlined_call_operand.vmem [shape: f32[64,4], index: 1, kind: input, shape index: {}]   ;;  %s4735_s2 = inlined_call_operand.vmem [shape: f32[128,128], index: 2, kind: input, shape index: {}]   ;;  %s4736_s3 = inlined_call_operand.vmem [shape: f32[128,128], index: 3, kind: input, shape index: {}]   ;;  %s4737_s4 = inlined_call_operand.vmem [shape: f32[4,128], index: 4, kind: input, shape index: {}]   ;;  %s4738_s5 = inlined_call_operand.vmem [shape: f32[1,128], index: 5, kind: input, shape index: {}]   ;;  %s4739_s6 = inlined_call_operand.vmem [shape: f32[1,128], index: 6, kind: input, shape index: {}]   ;;  %s4740_s7 = inlined_call_operand.vmem [shape: f32[64,128], index: 7, kind: output, shape index: {}]  }
   0x1 LB: > { %s2575_s25 = sadd.s32 4294967295, %s3573_s24   ;;  %p2579_p0 = scmp.ge.s32.totalorder %s3573_s24, 1  ;;  %s3573_s24 = sphi %s3615_s24, %s17_s24  }
   0x2   : > { %p249_p1 = scmp.lt.s32.totalorder %s3573_s24, 5 }
   0x4   : > { %p250_p2 = pnand %p2579_p0, %p249_p1 }
   0x6   : > { %253 = sbr.rel (%p250_p2) target bundleno = 897 (0x381), region = 48 }
   0xb   : > { %v321_v0 = vld [vmem:[%s4735_s2 + $0x78] sm:$0xff]  ;;  %v320_v1 = vld [vmem:[%s4735_s2 + $0x70] sm:$0xff]  ;;  %v319_v2 = vld [vmem:[%s4735_s2 + $0x68] sm:$0xff]  ;;  %s2580_s9 = sshll.u32 %s2575_s25, 1  ;;  %vm1724_vm0 = vcmask 1043456   ;;  %vm1717_vm1 = vcmask 31744  }
   0xc   : > { %v3632_v3 = vand.u32 4294901760, %v321_v0  ;;  %v3634_v4 = vand.u32 4294901760, %v320_v1  ;;  %v3636_v5 = vand.u32 4294901760, %v319_v2  ;;  %v318_v6 = vld [vmem:[%s4735_s2 + $0x60] sm:$0xff]  ;;  %v317_v7 = vld [vmem:[%s4735_s2 + $0x58] sm:$0xff]  ;;  %v316_v8 = vld [vmem:[%s4735_s2 + $0x50] sm:$0xff] }
   0xd   : > { %v3647_v9 = vand.u32 4294901760, %v318_v6  ;;  %v3649_v10 = vand.u32 4294901760, %v317_v7  ;;  %v3651_v11 = vand.u32 4294901760, %v316_v8  ;;  %v315_v12 = vld [vmem:[%s4735_s2 + $0x48] sm:$0xff]  ;;  %v314_v13 = vld [vmem:[%s4735_s2 + $0x40] sm:$0xff]  ;;  %v313_v18 = vld [vmem:[%s4735_s2 + $0x38] sm:$0xff] }
   0xe   : > { %2920 = vmatprep.subr.mxu0 %v3632_v3  ;;  %v3661_v14 = vsub.f32 %v321_v0, %v3632_v3  ;;  %v3664_v15 = vsub.f32 %v320_v1, %v3634_v4  ;;  %v3666_v16 = vand.u32 4294901760, %v315_v12  ;;  %v3669_v17 = vsub.f32 %v319_v2, %v3636_v5  ;;  %p287_p3 = scmp.lt.s32.totalorder %s2580_s9, 7  ;;  %v312_v25 = vld [vmem:[%s4735_s2 + $0x30] sm:$0xff]  ;;  %v311_v35 = vld [vmem:[%s4735_s2 + $0x28] sm:$0xff]  ;;  %v310_v40 = vld [vmem:[%s4735_s2 + $0x20] sm:$0xff] }
   0xf   : > { %2921 = vmatpush3.msra.mxu0 %v3632_v3  ;;  %v3676_v19 = vsub.f32 %v318_v6, %v3647_v9  ;;  %v3679_v20 = vsub.f32 %v317_v7, %v3649_v10  ;;  %v3691_v24 = vand.u32 4294901760, %v314_v13  ;;  %v3700_v27 = vand.u32 4294901760, %v313_v18  ;;  %v309_v48 = vld [vmem:[%s4735_s2 + $0x18] sm:$0xff]  ;;  %v308_v59 = vld [vmem:[%s4735_s2 + $0x10] sm:$0xff]  ;;  %v307_v2 = vld [vmem:[%s4735_s2 + $0x8] sm:$0xff] }
  0x10   : > { %2922 = vmatprep.subr.mxu0 %v3634_v4  ;;  %v3683_v21 = vand.u32 4294901760, %v3661_v14  ;;  %v3686_v22 = vand.u32 4294901760, %v3664_v15  ;;  %v3689_v23 = vand.u32 4294901760, %v3669_v17  ;;  %s4856_s9 = smov (!%p287_p3, %s2580_s9), 7  ;;  %v3706_v29 = vsub.f32 %v316_v8, %v3651_v11 }
  0x11   : > { %2923 = vmatpush3.msra.mxu0 %v3634_v4  ;;  %v3698_v26 = vand.u32 4294901760, %v3676_v19  ;;  %v3703_v28 = vand.u32 4294901760, %v3679_v20  ;;  %v3716_v33 = vsub.f32 %v315_v12, %v3666_v16  ;;  %s3718_s25 = sshll.u32 %s4856_s9, 3  ;;  %v3721_v34 = vand.u32 4294901760, %v312_v25 }
  0x12   : > { %2924 = vmatprep.subr.mxu0 %v3636_v5  ;;  %v427_v30 = vsub.f32 %v3661_v14, %v3683_v21  ;;  %v434_v31 = vsub.f32 %v3664_v15, %v3686_v22  ;;  %v441_v32 = vsub.f32 %v3669_v17, %v3689_v23  ;;  %v3734_v39 = vand.u32 4294901760, %v3706_v29  ;;  %s290_s9 = scalar_lea.vmem %s4733_s0, %s3718_s25  ;;  %s296_s11 = scalar_lea.vmem %s4734_s1, %s3718_s25 }
  0x13   : > { %2925 = vmatpush3.msra.mxu0 %v3636_v5  ;;  %v448_v38 = vsub.f32 %v3676_v19, %v3698_v26  ;;  %v455_v41 = vsub.f32 %v3679_v20, %v3703_v28  ;;  %v3747_v42 = vand.u32 4294901760, %v3716_v33  ;;  %v3750_v43 = vsub.f32 %v314_v13, %v3691_v24  ;;  %v3768_v49 = vld [vmem:[%s290_s9] sm:$0xff]  ;;  %v3782_v54 = vld [vmem:[%s290_s9 + $0x8] sm:$0xff]  ;;  %s302_s19 = scalar_lea.vmem %s4740_s7, %s3718_s25 }
  0x14   : > { %2926 = vmatprep.subr.mxu0 %v3647_v9  ;;  %v3727_v36 = vand.u32 4294901760, %v427_v30  ;;  %v3729_v37 = vand.u32 4294901760, %v434_v31  ;;  %v3754_v44 = vand.u32 4294901760, %v441_v32  ;;  %v3756_v45 = vand.u32 4294901760, %v311_v35  ;;  %4797 = vst [vmem:[#allocation4_spill] sm:$0xff] %v3768_v49  ;;  %4799 = vst [vmem:[#allocation6_spill] sm:$0xff] %v3782_v54 }
  0x15   : > { %2927 = vmatpush3.msra.mxu0 %v3647_v9  ;;  %v3759_v46 = vsub.f32 %v313_v18, %v3700_v27  ;;  %v3763_v47 = vand.u32 4294901760, %v310_v40  ;;  %v3772_v50 = vand.u32 4294901760, %v448_v38  ;;  %v462_v51 = vsub.f32 %v3706_v29, %v3734_v39  ;;  %v306_v18 = vld [vmem:[%s4735_s2] sm:$0xff] }
  0x16   : > { %4795 = vst [vmem:[#allocation2_spill] sm:$0xff] %v3729_v37  ;;  %2928 = vmatprep.subr.mxu0 %v3649_v10  ;;  %2955 = vmatprep.subr.mxu1 %v3727_v36  ;;  %4796 = vst [vmem:[#allocation3_spill] sm:$0xff] %v3754_v44  ;;  %v3777_v52 = vand.u32 4294901760, %v3750_v43  ;;  %v3780_v53 = vsub.f32 %v312_v25, %v3721_v34  ;;  %v3786_v55 = vand.u32 4294901760, %v455_v41  ;;  %v3792_v57 = vand.u32 4294901760, %v309_v48 }
  0x17   : > { %2929 = vmatpush3.msra.mxu0 %v3649_v10  ;;  %2956 = vmatpush3.msra.mxu1 %v3727_v36  ;;  %4798 = vst [vmem:[#allocation5_spill] sm:$0xff] %v3772_v50  ;;  %v469_v56 = vsub.f32 %v3716_v33, %v3747_v42  ;;  %v3795_v58 = vand.u32 4294901760, %v3759_v46  ;;  %v3801_v60 = vsub.f32 %v311_v35, %v3756_v45  ;;  %v3804_v61 = vand.u32 4294901760, %v3768_v49 }
  0x18   : > { %2930 = vmatprep.subr.mxu0 %v3651_v11  ;;  %2957 = vmatprep.subr.mxu1 %v3729_v37  ;;  %4800 = vst [vmem:[#allocation7_spill] sm:$0xff] %v3786_v55  ;;  %v3809_v62 = vand.u32 4294901760, %v3782_v54  ;;  %v3813_v63 = vand.u32 4294901760, %v462_v51  ;;  %v476_v0 = vsub.f32 %v3750_v43, %v3777_v52  ;;  %v3818_v1 = vand.u32 4294901760, %v3780_v53 }
  0x19   : > { %2931 = vmatpush3.msra.mxu0 %v3651_v11  ;;  %2958 = vmatpush3.msra.mxu1 %v3729_v37  ;;  %4801 = vst [vmem:[#allocation8_spill] sm:$0xff] %v3795_v58  ;;  %v3824_v6 = vsub.f32 %v310_v40, %v3763_v47  ;;  %v3828_v7 = vand.u32 4294901760, %v469_v56  ;;  %v3830_v8 = vand.u32 4294901760, %v308_v59  ;;  %v483_v12 = vsub.f32 %v3759_v46, %v3795_v58 }
  0x1a   : > { %2932 = vmatprep.subr.mxu0 %v3666_v16  ;;  %2959 = vmatprep.subr.mxu1 %v3754_v44  ;;  %4802 = vst [vmem:[#allocation9_spill] sm:$0xff] %v3813_v63  ;;  %4803 = vst [vmem:[#allocation10_spill] sm:$0xff] %v3818_v1  ;;  %v3837_v13 = vand.u32 4294901760, %v3801_v60  ;;  %v3844_v25 = vsub.f32 %v3768_v49, %v3804_v61  ;;  %v3847_v30 = vsub.f32 %v309_v48, %v3792_v57 }
  0x1b   : > { %2933 = vmatpush3.msra.mxu0 %v3666_v16  ;;  %2960 = vmatpush3.msra.mxu1 %v3754_v44  ;;  %4804 = vst [vmem:[#allocation11_spill] sm:$0xff] %v3828_v7  ;;  %v3851_v31 = vand.u32 4294901760, %v307_v2  ;;  %v3855_v32 = vsub.f32 %v3782_v54, %v3809_v62  ;;  %v3859_v35 = vand.u32 4294901760, %v476_v0  ;;  %v490_v38 = vsub.f32 %v3780_v53, %v3818_v1 }
  0x1c   : > { %2934 = vmatprep.subr.mxu0 %v3691_v24  ;;  %2961 = vmatprep.subr.mxu1 %v3772_v50  ;;  %4805 = vst [vmem:[#allocation12_spill] sm:$0xff] %v3837_v13  ;;  %v3864_v40 = vand.u32 4294901760, %v3824_v6  ;;  %v3868_v41 = vand.u32 4294901760, %v306_v18  ;;  %v3871_v48 = vsub.f32 %v308_v59, %v3830_v8  ;;  %v3875_v51 = vand.u32 4294901760, %v483_v12 }
  0x1d   : > { %2935 = vmatpush3.msra.mxu0 %v3691_v24  ;;  %2962 = vmatpush3.msra.mxu1 %v3772_v50  ;;  %4806 = vst [vmem:[#allocation13_spill] sm:$0xff] %v3859_v35  ;;  %v497_v56 = vsub.f32 %v3801_v60, %v3837_v13  ;;  %v3881_v49 = vand.u32 4294901760, %v3847_v30  ;;  %v3887_v54 = vsub.f32 %v307_v2, %v3851_v31  ;;  %v3891_v12 = vand.u32 4294901760, %v490_v38 }
  0x1e   : > { %2936 = vmatprep.subr.mxu0 %v3700_v27  ;;  %2963 = vmatprep.subr.mxu1 %v3786_v55  ;;  %4807 = vst [vmem:[#allocation14_spill] sm:$0xff] %v3864_v40  ;;  %4808 = vst [vmem:[#allocation15_spill] sm:$0xff] %v3875_v51  ;;  %v504_v0 = vsub.f32 %v3824_v6, %v3864_v40  ;;  %v3901_v59 = vsub.f32 %v306_v18, %v3868_v41  ;;  %v4812_v38 = vand.u32 4294901760, %v3844_v25 }
  0x1f   : > { %2937 = vmatpush3.msra.mxu0 %v3700_v27  ;;  %2964 = vmatpush3.msra.mxu1 %v3786_v55  ;;  %4809 = vst [vmem:[#allocation16_spill] sm:$0xff] %v3881_v49  ;;  %4810 = vst [vmem:[#allocation17_spill] sm:$0xff] %v3891_v12  ;;  %v3905_v2 = vand.u32 4294901760, %v497_v56  ;;  %v511_v55 = vsub.f32 %v3847_v30, %v3881_v49  ;;  %v4813_v18 = vand.u32 4294901760, %v3855_v32  ;;  %v3918_v50 = vand.u32 4294901760, %v3887_v54 }
  0x20   : > { %2938 = vmatprep.subr.mxu0 %v3721_v34  ;;  %2965 = vmatprep.subr.mxu1 %v3813_v63  ;;  %v3922_v56 = vand.u32 4294901760, %v504_v0 }
  0x21   : > { %2939 = vmatpush3.msra.mxu0 %v3721_v34  ;;  %2966 = vmatpush3.msra.mxu1 %v3813_v63  ;;  %v406_v63 = vsub.f32 %v3844_v25, %v4812_v38  ;;  %4814 = vst [vmem:[#allocation19_spill] sm:$0xff] %v3918_v50  ;;  %v3933_v44 = vand.u32 4294901760, %v511_v55 }
  0x22   : > { %2940 = vmatprep.subr.mxu0 %v3756_v45  ;;  %2967 = vmatprep.subr.mxu1 %v3828_v7 }
  0x23   : > { %2941 = vmatpush3.msra.mxu0 %v3756_v45  ;;  %2968 = vmatpush3.msra.mxu1 %v3828_v7  ;;  %v3898_v7 = vand.u32 4294901760, %v3871_v48 }
  0x24   : > { %2942 = vmatprep.subr.mxu0 %v3763_v47  ;;  %2969 = vmatprep.subr.mxu1 %v3859_v35 }
  0x25   : > { %2943 = vmatpush3.msra.mxu0 %v3763_v47  ;;  %2970 = vmatpush3.msra.mxu1 %v3859_v35  ;;  %4811 = vst [vmem:[#allocation18_spill] sm:$0xff] %v3898_v7  ;;  %v416_v35 = vsub.f32 %v3855_v32, %v4813_v18  ;;  %v518_v38 = vsub.f32 %v3871_v48, %v3898_v7  ;;  %v407_v18 = vand.u32 4294901760, %v406_v63 }
  0x26   : > { %2944 = vmatprep.subr.mxu0 %v3792_v57  ;;  %2971 = vmatprep.subr.mxu1 %v3875_v51 }
  0x27   : > { %2945 = vmatpush3.msra.mxu0 %v3792_v57  ;;  %2972 = vmatpush3.msra.mxu1 %v3875_v51  ;;  %v3929_v51 = vand.u32 4294901760, %v3901_v59  ;;  %v417_v0 = vand.u32 4294901760, %v416_v35  ;;  %v3943_v37 = vand.u32 4294901760, %v518_v38  ;;  %v4817_v38 = vand.u32 4294901760, %v3855_v32 }
  0x28   : > { %2946 = vmatprep.subr.mxu0 %v3830_v8  ;;  %2973 = vmatprep.subr.mxu1 %v3891_v12 }
  0x29   : > { %2947 = vmatpush3.msra.mxu0 %v3830_v8  ;;  %2974 = vmatpush3.msra.mxu1 %v3891_v12  ;;  %4815 = vst [vmem:[#allocation20_spill] sm:$0xff] %v3929_v51  ;;  %v525_v12 = vsub.f32 %v3887_v54, %v3918_v50  ;;  %v532_v55 = vsub.f32 %v3901_v59, %v3929_v51 }
  0x2a   : > { %2948 = vmatprep.subr.mxu0 %v3851_v31  ;;  %2975 = vmatprep.subr.mxu1 %v3905_v2 }
  0x2b   : > { %2949 = vmatpush3.msra.mxu0 %v3851_v31  ;;  %2976 = vmatpush3.msra.mxu1 %v3905_v2  ;;  %v3949_v63 = vand.u32 4294901760, %v525_v12  ;;  %v3955_v35 = vand.u32 4294901760, %v532_v55  ;;  %v4816_v12 = vand.u32 4294901760, %v3844_v25  ;;  %v4825_v55 = vld [vmem:[#allocation15_spill] sm:$0xff] }
  0x2c   : > { %2950 = vmatprep.subr.mxu0 %v3868_v41  ;;  %2977 = vmatprep.subr.mxu1 %v3922_v56 }
  0x2d   : > { %2951 = vmatpush3.msra.mxu0 %v3868_v41  ;;  %2978 = vmatpush3.msra.mxu1 %v3922_v56 }
  0x2e   : > { %2952 = vmatprep.mubr.f32.mxu0 %v407_v18  ;;  %2979 = vmatprep.subr.mxu1 %v3933_v44  ;;  %v4823_v18 = vld [vmem:[#allocation11_spill] sm:$0xff] }
  0x2f   : > { %2990 = vmatprep.subr.mxu0 %v3661_v14  ;;  %2953 = vmatmul.mubr.f32.vlgmr.msra.gmra.mxu0 %v417_v0  ;;  %v4824_v0 = vld [vmem:[#allocation13_spill] sm:$0xff] }
  0x30   : > { %2980 = vmatpush3.msra.mxu1 %v3933_v44  ;;  %2991 = vmatpush3.msra.mxu0 %v3661_v14 }
  0x31   : > { %2981 = vmatprep.subr.mxu1 %v3943_v37  ;;  %2992 = vmatprep.subr.mxu0 %v3664_v15 }
  0x32   : > { %2982 = vmatpush3.msra.mxu1 %v3943_v37  ;;  %2993 = vmatpush3.msra.mxu0 %v3664_v15 }
  0x33   : > { %2983 = vmatprep.subr.mxu1 %v3949_v63  ;;  %2994 = vmatprep.subr.mxu0 %v3669_v17 }
  0x34   : > { %2984 = vmatpush3.msra.mxu1 %v3949_v63  ;;  %2995 = vmatpush3.msra.mxu0 %v3669_v17 }
  0x35   : > { %2985 = vmatprep.subr.mxu1 %v3955_v35  ;;  %2996 = vmatprep.subr.mxu0 %v3676_v19 }
  0x36   : > { %2986 = vmatpush3.msra.mxu1 %v3955_v35  ;;  %2987 = vmatprep.mubr.f32.mxu1 %v3804_v61 }
  0x37   : > { %2997 = vmatpush3.msra.mxu0 %v3676_v19  ;;  %2988 = vmatmul.mubr.f32.vlgmr.msra.gmra.mxu1 %v3809_v62 }
  0x38   : > { %2998 = vmatprep.subr.mxu0 %v3679_v20  ;;  %3025 = vmatprep.subr.mxu1 %v3632_v3 }
  0x39   : > { %2999 = vmatpush3.msra.mxu0 %v3679_v20  ;;  %3026 = vmatpush3.msra.mxu1 %v3632_v3 }
  0x3a   : > { %3000 = vmatprep.subr.mxu0 %v3706_v29  ;;  %3027 = vmatprep.subr.mxu1 %v3634_v4 }
  0x3b   : > { %3001 = vmatpush3.msra.mxu0 %v3706_v29  ;;  %3028 = vmatpush3.msra.mxu1 %v3634_v4 }
  0x3c   : > { %3002 = vmatprep.subr.mxu0 %v3716_v33  ;;  %3029 = vmatprep.subr.mxu1 %v3636_v5 }
  0x3d   : > { %3003 = vmatpush3.msra.mxu0 %v3716_v33  ;;  %3030 = vmatpush3.msra.mxu1 %v3636_v5 }
  0x3e   : > { %3004 = vmatprep.subr.mxu0 %v3750_v43  ;;  %3031 = vmatprep.subr.mxu1 %v3647_v9 }
  0x3f   : > { %3005 = vmatpush3.msra.mxu0 %v3750_v43  ;;  %3032 = vmatpush3.msra.mxu1 %v3647_v9 }
  0x40   : > { %3006 = vmatprep.subr.mxu0 %v3759_v46  ;;  %3033 = vmatprep.subr.mxu1 %v3649_v10 }
  0x41   : > { %3007 = vmatpush3.msra.mxu0 %v3759_v46  ;;  %3034 = vmatpush3.msra.mxu1 %v3649_v10 }
  0x42   : > { %3008 = vmatprep.subr.mxu0 %v3780_v53  ;;  %3035 = vmatprep.subr.mxu1 %v3651_v11 }
  0x43   : > { %3009 = vmatpush3.msra.mxu0 %v3780_v53  ;;  %3036 = vmatpush3.msra.mxu1 %v3651_v11 }
  0x44   : > { %3010 = vmatprep.subr.mxu0 %v3801_v60  ;;  %3037 = vmatprep.subr.mxu1 %v3666_v16 }
  0x45   : > { %3011 = vmatpush3.msra.mxu0 %v3801_v60  ;;  %3038 = vmatpush3.msra.mxu1 %v3666_v16 }
  0x46   : > { %3012 = vmatprep.subr.mxu0 %v3824_v6  ;;  %3039 = vmatprep.subr.mxu1 %v3691_v24 }
  0x47   : > { %3013 = vmatpush3.msra.mxu0 %v3824_v6  ;;  %3040 = vmatpush3.msra.mxu1 %v3691_v24 }
  0x48   : > { %3014 = vmatprep.subr.mxu0 %v3847_v30  ;;  %3041 = vmatprep.subr.mxu1 %v3700_v27 }
  0x49   : > { %3015 = vmatpush3.msra.mxu0 %v3847_v30  ;;  %3042 = vmatpush3.msra.mxu1 %v3700_v27 }
  0x4a   : > { %3016 = vmatprep.subr.mxu0 %v3871_v48  ;;  %3043 = vmatprep.subr.mxu1 %v3721_v34 }
  0x4b   : > { %3017 = vmatpush3.msra.mxu0 %v3871_v48  ;;  %3044 = vmatpush3.msra.mxu1 %v3721_v34 }
  0x4c   : > { %3018 = vmatprep.subr.mxu0 %v3887_v54  ;;  %3045 = vmatprep.subr.mxu1 %v3756_v45 }
  0x4d   : > { %3019 = vmatpush3.msra.mxu0 %v3887_v54  ;;  %3046 = vmatpush3.msra.mxu1 %v3756_v45 }
  0x4e   : > { %3020 = vmatprep.subr.mxu0 %v3901_v59  ;;  %3047 = vmatprep.subr.mxu1 %v3763_v47 }
  0x4f   : > { %3021 = vmatpush3.msra.mxu0 %v3901_v59  ;;  %3022 = vmatprep.mubr.f32.mxu0 %v3844_v25  ;;  %v4819_v25 = vld [vmem:[#allocation3_spill] sm:$0xff] }
  0x50   : > { %3048 = vmatpush3.msra.mxu1 %v3763_v47  ;;  %3023 = vmatmul.mubr.f32.vlgmr.msra.gmra.mxu0 %v3855_v32  ;;  %v4822_v32 = vld [vmem:[#allocation9_spill] sm:$0xff] }
  0x51   : > { %3049 = vmatprep.subr.mxu1 %v3792_v57  ;;  %3060 = vmatprep.subr.mxu0 %v3683_v21 }
  0x52   : > { %3050 = vmatpush3.msra.mxu1 %v3792_v57  ;;  %3061 = vmatpush3.msra.mxu0 %v3683_v21 }
  0x53   : > { %3051 = vmatprep.subr.mxu1 %v3830_v8  ;;  %3062 = vmatprep.subr.mxu0 %v3686_v22 }
  0x54   : > { %3052 = vmatpush3.msra.mxu1 %v3830_v8  ;;  %3063 = vmatpush3.msra.mxu0 %v3686_v22 }
  0x55   : > { %3053 = vmatprep.subr.mxu1 %v3851_v31  ;;  %3064 = vmatprep.subr.mxu0 %v3689_v23 }
  0x56   : > { %3054 = vmatpush3.msra.mxu1 %v3851_v31  ;;  %3065 = vmatpush3.msra.mxu0 %v3689_v23 }
  0x57   : > { %3055 = vmatprep.subr.mxu1 %v3868_v41  ;;  %3066 = vmatprep.subr.mxu0 %v3698_v26 }
  0x58   : > { %3056 = vmatpush3.msra.mxu1 %v3868_v41  ;;  %3057 = vmatprep.mubr.f32.mxu1 %v4816_v12  ;;  %v4826_v12 = vld [vmem:[#allocation17_spill] sm:$0xff] }
  0x59   : > { %3067 = vmatpush3.msra.mxu0 %v3698_v26  ;;  %3058 = vmatmul.mubr.f32.vlgmr.msra.gmra.mxu1 %v4817_v38 }
  0x5a   : > { %3068 = vmatprep.subr.mxu0 %v3703_v28  ;;  %3095 = vmatprep.subr.mxu1 %v3632_v3 }
  0x5b   : > { %3069 = vmatpush3.msra.mxu0 %v3703_v28  ;;  %3096 = vmatpush3.msra.mxu1 %v3632_v3 }
  0x5c   : > { %3070 = vmatprep.subr.mxu0 %v3734_v39  ;;  %3097 = vmatprep.subr.mxu1 %v3634_v4 }
  0x5d   : > { %3071 = vmatpush3.msra.mxu0 %v3734_v39  ;;  %3098 = vmatpush3.msra.mxu1 %v3634_v4 }
  0x5e   : > { %3072 = vmatprep.subr.mxu0 %v3747_v42  ;;  %3099 = vmatprep.subr.mxu1 %v3636_v5 }
  0x5f   : > { %3073 = vmatpush3.msra.mxu0 %v3747_v42  ;;  %3100 = vmatpush3.msra.mxu1 %v3636_v5 }
  0x60   : > { %3074 = vmatprep.subr.mxu0 %v3777_v52  ;;  %3101 = vmatprep.subr.mxu1 %v3647_v9 }
  0x61   : > { %3075 = vmatpush3.msra.mxu0 %v3777_v52  ;;  %3102 = vmatpush3.msra.mxu1 %v3647_v9 }
  0x62   : > { %3076 = vmatprep.subr.mxu0 %v3795_v58  ;;  %3103 = vmatprep.subr.mxu1 %v3649_v10 }
  0x63   : > { %3077 = vmatpush3.msra.mxu0 %v3795_v58  ;;  %3104 = vmatpush3.msra.mxu1 %v3649_v10 }
  0x64   : > { %3078 = vmatprep.subr.mxu0 %v3818_v1  ;;  %3105 = vmatprep.subr.mxu1 %v3651_v11 }
  0x65   : > { %3079 = vmatpush3.msra.mxu0 %v3818_v1  ;;  %3106 = vmatpush3.msra.mxu1 %v3651_v11 }
  0x66   : > { %3080 = vmatprep.subr.mxu0 %v3837_v13  ;;  %3107 = vmatprep.subr.mxu1 %v3666_v16 }
  0x67   : > { %3081 = vmatpush3.msra.mxu0 %v3837_v13  ;;  %3108 = vmatpush3.msra.mxu1 %v3666_v16  ;;  %v4827_v13 = vld [vmem:[#allocation6_spill] sm:$0xff] }
  0x68   : > { %3082 = vmatprep.subr.mxu0 %v3864_v40  ;;  %3109 = vmatprep.subr.mxu1 %v3691_v24 }
  0x69   : > { %3083 = vmatpush3.msra.mxu0 %v3864_v40  ;;  %3110 = vmatpush3.msra.mxu1 %v3691_v24 }
  0x6a   : > { %3084 = vmatprep.subr.mxu0 %v3881_v49  ;;  %3111 = vmatprep.subr.mxu1 %v3700_v27 }
  0x6b   : > { %3085 = vmatpush3.msra.mxu0 %v3881_v49  ;;  %3112 = vmatpush3.msra.mxu1 %v3700_v27 }
  0x6c   : > { %3086 = vmatprep.subr.mxu0 %v3898_v7  ;;  %3113 = vmatprep.subr.mxu1 %v3721_v34 }
  0x6d   : > { %3087 = vmatpush3.msra.mxu0 %v3898_v7  ;;  %3114 = vmatpush3.msra.mxu1 %v3721_v34 }
  0x6e   : > { %3088 = vmatprep.subr.mxu0 %v3918_v50  ;;  %3115 = vmatprep.subr.mxu1 %v3756_v45 }
  0x6f   : > { %3089 = vmatpush3.msra.mxu0 %v3918_v50  ;;  %3116 = vmatpush3.msra.mxu1 %v3756_v45 }
  0x70   : > { %3090 = vmatprep.subr.mxu0 %v3929_v51  ;;  %3117 = vmatprep.subr.mxu1 %v3763_v47 }
  0x71   : > { %3091 = vmatpush3.msra.mxu0 %v3929_v51  ;;  %3092 = vmatprep.mubr.f32.mxu0 %v3804_v61 }
  0x72   : > { %3118 = vmatpush3.msra.mxu1 %v3763_v47  ;;  %3093 = vmatmul.mubr.f32.vlgmr.msra.gmra.mxu0 %v3809_v62 }
  0x73   : > { %3119 = vmatprep.subr.mxu1 %v3792_v57  ;;  %3127 = vmatprep.mubr.f32.mxu1 %v3804_v61  ;;  %v4818_v61 = vld [vmem:[#allocation2_spill] sm:$0xff] }
  0x74   : > { %3120 = vmatpush3.msra.mxu1 %v3792_v57  ;;  %3130 = vmatprep.subr.mxu0 %v3632_v3 }
  0x75   : > { %3121 = vmatprep.subr.mxu1 %v3830_v8  ;;  %3131 = vmatpush3.msra.mxu0 %v3632_v3 }
  0x76   : > { %3122 = vmatpush3.msra.mxu1 %v3830_v8  ;;  %3132 = vmatprep.subr.mxu0 %v3634_v4 }
  0x77   : > { %3123 = vmatprep.subr.mxu1 %v3851_v31  ;;  %3133 = vmatpush3.msra.mxu0 %v3634_v4 }
  0x78   : > { %3124 = vmatpush3.msra.mxu1 %v3851_v31  ;;  %3134 = vmatprep.subr.mxu0 %v3636_v5 }
  0x79   : > { %3125 = vmatprep.subr.mxu1 %v3868_v41  ;;  %3135 = vmatpush3.msra.mxu0 %v3636_v5 }
  0x7a   : > { %3126 = vmatpush3.msra.mxu1 %v3868_v41  ;;  %3136 = vmatprep.subr.mxu0 %v3647_v9 }
  0x7b   : > { %3128 = vmatmul.mubr.f32.vlgmr.msra.gmra.mxu1 %v3809_v62  ;;  %3165 = vmatprep.subr.mxu1 %v3727_v36  ;;  %v4820_v62 = vld [vmem:[#allocation5_spill] sm:$0xff] }
  0x7c   : > { %3166 = vmatpush3.msra.mxu1 %v3727_v36  ;;  %3137 = vmatpush3.msra.mxu0 %v3647_v9  ;;  %v4821_v36 = vld [vmem:[#allocation7_spill] sm:$0xff] }
  0x7d   : > { %3167 = vmatprep.subr.mxu1 %v4818_v61  ;;  %3138 = vmatprep.subr.mxu0 %v3649_v10 }
  0x7e   : > { %3168 = vmatpush3.msra.mxu1 %v4818_v61  ;;  %3139 = vmatpush3.msra.mxu0 %v3649_v10 }
  0x7f   : > { %3169 = vmatprep.subr.mxu1 %v4819_v25  ;;  %3140 = vmatprep.subr.mxu0 %v3651_v11 }
  0x80   : > { %3170 = vmatpush3.msra.mxu1 %v4819_v25  ;;  %3141 = vmatpush3.msra.mxu0 %v3651_v11 }
  0x81   : > { %3171 = vmatprep.subr.mxu1 %v4820_v62  ;;  %3142 = vmatprep.subr.mxu0 %v3666_v16 }
  0x82   : > { %3172 = vmatpush3.msra.mxu1 %v4820_v62  ;;  %3143 = vmatpush3.msra.mxu0 %v3666_v16 }
  0x83   : > { %3173 = vmatprep.subr.mxu1 %v4821_v36  ;;  %3144 = vmatprep.subr.mxu0 %v3691_v24 }
  0x84   : > { %3174 = vmatpush3.msra.mxu1 %v4821_v36  ;;  %3145 = vmatpush3.msra.mxu0 %v3691_v24 }
  0x85   : > { %3175 = vmatprep.subr.mxu1 %v4822_v32  ;;  %3146 = vmatprep.subr.mxu0 %v3700_v27 }
  0x86   : > { %3176 = vmatpush3.msra.mxu1 %v4822_v32  ;;  %3147 = vmatpush3.msra.mxu0 %v3700_v27 }
  0x87   : > { %3177 = vmatprep.subr.mxu1 %v4823_v18  ;;  %3148 = vmatprep.subr.mxu0 %v3721_v34 }
  0x88   : > { %3178 = vmatpush3.msra.mxu1 %v4823_v18  ;;  %3149 = vmatpush3.msra.mxu0 %v3721_v34 }
  0x89   : > { %3179 = vmatprep.subr.mxu1 %v4824_v0  ;;  %3150 = vmatprep.subr.mxu0 %v3756_v45 }
  0x8a   : > { %3180 = vmatpush3.msra.mxu1 %v4824_v0  ;;  %3151 = vmatpush3.msra.mxu0 %v3756_v45 }
  0x8b   : > { %3181 = vmatprep.subr.mxu1 %v4825_v55  ;;  %3152 = vmatprep.subr.mxu0 %v3763_v47 }
  0x8c   : > { %3182 = vmatpush3.msra.mxu1 %v4825_v55  ;;  %3153 = vmatpush3.msra.mxu0 %v3763_v47 }
  0x8d   : > { %3183 = vmatprep.subr.mxu1 %v4826_v12  ;;  %3154 = vmatprep.subr.mxu0 %v3792_v57 }
  0x8e   : > { %3184 = vmatpush3.msra.mxu1 %v4826_v12  ;;  %3155 = vmatpush3.msra.mxu0 %v3792_v57 }
  0x8f   : > { %3185 = vmatprep.subr.mxu1 %v3905_v2  ;;  %3156 = vmatprep.subr.mxu0 %v3830_v8 }
  0x90   : > { %3186 = vmatpush3.msra.mxu1 %v3905_v2  ;;  %3157 = vmatpush3.msra.mxu0 %v3830_v8 }
  0x91   : > { %3187 = vmatprep.subr.mxu1 %v3922_v56  ;;  %3158 = vmatprep.subr.mxu0 %v3851_v31 }
  0x92   : > { %3188 = vmatpush3.msra.mxu1 %v3922_v56  ;;  %3159 = vmatpush3.msra.mxu0 %v3851_v31 }
  0x93   : > { %3189 = vmatprep.subr.mxu1 %v3933_v44  ;;  %3160 = vmatprep.subr.mxu0 %v3868_v41 }
  0x94   : > { %3190 = vmatpush3.msra.mxu1 %v3933_v44  ;;  %3161 = vmatpush3.msra.mxu0 %v3868_v41 }
  0x95   : > { %3191 = vmatprep.subr.mxu1 %v3943_v37  ;;  %3200 = vmatprep.subr.mxu0 %v3661_v14 }
  0x96   : > { %3192 = vmatpush3.msra.mxu1 %v3943_v37 }
  0x97   : > { %3193 = vmatprep.subr.mxu1 %v3949_v63 }
  0x98   : > { %3194 = vmatpush3.msra.mxu1 %v3949_v63 }
  0x99   : > { %3195 = vmatprep.subr.mxu1 %v3955_v35 }
  0x9a   : > { %3196 = vmatpush3.msra.mxu1 %v3955_v35 }
  0x9b   : > { %3235 = vmatprep.subr.mxu1 %v3632_v3 }
  0xef   : > { %v2954_v2 = vpop.f32.mrf.mxu0 }
  0xf1   : > { %v409_v44 = vpop.f32.mrf.mxu0 }
  0xf7   : > { %v2989_v56 = vpop.f32.mrf.mxu1 }
  0xf8   : > { %v577_v36 = vadd.f32 %v2989_v56, %v2954_v2  ;;  %v4828_v56 = vld [vmem:[#allocation4_spill] sm:$0xff] }
  0xf9   : > { %v570_v61 = vpop.f32.mrf.mxu1 }
  0xfa   : > { %v571_v37 = vadd.f32 %v570_v61, %v409_v44 }
 0x110   : > { %v3024_v38 = vpop.f32.mrf.mxu0 }
 0x111   : > { %v688_v18 = vadd.f32 %v3024_v38, %v577_v36 }
 0x112   : > { %v680_v25 = vpop.f32.mrf.mxu0 }
 0x113   : > { %v681_v55 = vadd.f32 %v680_v25, %v571_v37 }
 0x119   : > { %v3059_v62 = vpop.f32.mrf.mxu1 }
 0x11a   : > { %v785_v63 = vadd.f32 %v3059_v62, %v688_v18  ;;  %v1706_v18 = vld [vmem:[%s4736_s3 + $0x40] sm:$0xff] }
 0x11b   : > { %v776_v0 = vpop.f32.mrf.mxu1 }
 0x11c   : > { %v777_v51 = vadd.f32 %v776_v0, %v681_v55 }
 0x132   : > { %v3094_v32 = vpop.f32.mrf.mxu0 }
 0x133   : > { %v910_v50 = vadd.f32 %v3094_v32, %v785_v63 }
 0x134   : > { %v903_v12 = vpop.f32.mrf.mxu0 }
 0x135   : > { %v904_v7 = vadd.f32 %v903_v12, %v777_v51  ;;  %v4425_v12 = vand.u32 4294901760, %v1706_v18 }
 0x13b   : > { %v3129_v35 = vpop.f32.mrf.mxu1 }
 0x13c   : > { %v1003_v49 = vadd.f32 %v3129_v35, %v910_v50 }
 0x13d   : > { %v996_v40 = vpop.f32.mrf.mxu1 }
 0x13e   : > { %v4166_v1 = vsub.f32 %v4827_v13, %v1003_v49  ;;  %v997_v58 = vadd.f32 %v996_v40, %v904_v7 }
 0x140   : > { %v1009_v2 = vmul.f32 %v4166_v1, %v4166_v1  ;;  %v4171_v44 = vsub.f32 %v4828_v56, %v997_v58 }
 0x142   : > { %v4173_v38 = vand.u32 4294901760, %v1009_v2  ;;  %v1008_v61 = vmul.f32 %v4171_v44, %v4171_v44 }
 0x144   : > { %v4178_v25 = vsub.f32 %v1009_v2, %v4173_v38  ;;  %v4180_v50 = vand.u32 4294901760, %v1008_v61  ;;  %v1705_v2 = vld [vmem:[%s4736_s3 + $0x38] sm:$0xff] }
 0x146   : > { %v1092_v49 = vsub.f32 %v1008_v61, %v4180_v50  ;;  %3197 = vmatprep.mubr.f32.mxu1 %v4180_v50  ;;  %v1103_v7 = vand.u32 4294901760, %v4178_v25  ;;  %v4440_v61 = vsub.f32 %v1706_v18, %v4425_v12 }
 0x147   : > { %3198 = vmatmul.mubr.f32.vlgmr.msra.gmra.mxu1 %v4173_v38 }
 0x148   : > { %3236 = vmatpush3.msra.mxu1 %v3632_v3  ;;  %v1093_v58 = vand.u32 4294901760, %v1092_v49  ;;  %v1104_v13 = vsub.f32 %v4178_v25, %v1103_v7 }
 0x149   : > { %3237 = vmatprep.subr.mxu1 %v3634_v4 }
 0x14a   : > { %3238 = vmatpush3.msra.mxu1 %v3634_v4  ;;  %3267 = vmatprep.mubr.f32.mxu1 %v1093_v58  ;;  %v1094_v40 = vsub.f32 %v1092_v49, %v1093_v58  ;;  %v1105_v62 = vand.u32 4294901760, %v1104_v13  ;;  %v4452_v13 = vand.u32 4294901760, %v4440_v61 }
 0x14b   : > { %3239 = vmatprep.subr.mxu1 %v3636_v5 }
 0x14c   : > { %3240 = vmatpush3.msra.mxu1 %v3636_v5  ;;  %v1095_v51 = vand.u32 4294901760, %v1094_v40  ;;  %4837 = vst [vmem:[#allocation2_spill] sm:$0xff] %v4452_v13 }
 0x14d   : > { %3241 = vmatprep.subr.mxu1 %v3647_v9 }
 0x14e   : > { %3242 = vmatpush3.msra.mxu1 %v3647_v9  ;;  %3162 = vmatprep.mubr.f32.mxu0 %v1095_v51 }
 0x14f   : > { %3243 = vmatprep.subr.mxu1 %v3649_v10  ;;  %3163 = vmatmul.mubr.f32.vlgmr.msra.gmra.mxu0 %v1105_v62  ;;  %v1703_v62 = vld [vmem:[%s4736_s3 + $0x28] sm:$0xff] }
 0x150   : > { %3201 = vmatpush3.msra.mxu0 %v3661_v14  ;;  %3244 = vmatpush3.msra.mxu1 %v3649_v10  ;;  %v4835_v14 = vld [vmem:[#allocation19_spill] sm:$0xff] }
 0x151   : > { %3202 = vmatprep.subr.mxu0 %v3664_v15  ;;  %3232 = vmatprep.mubr.f32.mxu0 %v1092_v49  ;;  %v1704_v49 = vld [vmem:[%s4736_s3 + $0x30] sm:$0xff] }
 0x152   : > { %3245 = vmatprep.subr.mxu1 %v3651_v11  ;;  %3203 = vmatpush3.msra.mxu0 %v3664_v15  ;;  %v4836_v15 = vld [vmem:[#allocation20_spill] sm:$0xff]  ;;  %v4458_v51 = vand.u32 4294901760, %v1704_v49 }
 0x153   : > { %3246 = vmatpush3.msra.mxu1 %v3651_v11  ;;  %3204 = vmatprep.subr.mxu0 %v3669_v17 }
 0x154   : > { %3247 = vmatprep.subr.mxu1 %v3666_v16  ;;  %3205 = vmatpush3.msra.mxu0 %v3669_v17  ;;  %v1713_v17 = vld [vmem:[%s4736_s3 + $0x78] sm:$0xff] }
 0x155   : > { %3248 = vmatpush3.msra.mxu1 %v3666_v16  ;;  %3206 = vmatprep.subr.mxu0 %v3676_v19 }
 0x156   : > { %3249 = vmatprep.subr.mxu1 %v3691_v24  ;;  %3207 = vmatpush3.msra.mxu0 %v3676_v19  ;;  %v4328_v19 = vand.u32 4294901760, %v1713_v17 }
 0x157   : > { %3250 = vmatpush3.msra.mxu1 %v3691_v24  ;;  %3208 = vmatprep.subr.mxu0 %v3679_v20 }
 0x158   : > { %3251 = vmatprep.subr.mxu1 %v3700_v27  ;;  %3209 = vmatpush3.msra.mxu0 %v3679_v20  ;;  %v1712_v20 = vld [vmem:[%s4736_s3 + $0x70] sm:$0xff] }
 0x159   : > { %3252 = vmatpush3.msra.mxu1 %v3700_v27  ;;  %3210 = vmatprep.subr.mxu0 %v3706_v29 }
 0x15a   : > { %3253 = vmatprep.subr.mxu1 %v3721_v34  ;;  %3211 = vmatpush3.msra.mxu0 %v3706_v29 }
 0x15b   : > { %3254 = vmatpush3.msra.mxu1 %v3721_v34  ;;  %3212 = vmatprep.subr.mxu0 %v3716_v33 }
 0x15c   : > { %3255 = vmatprep.subr.mxu1 %v3756_v45  ;;  %3213 = vmatpush3.msra.mxu0 %v3716_v33 }
 0x15d   : > { %3256 = vmatpush3.msra.mxu1 %v3756_v45  ;;  %3214 = vmatprep.subr.mxu0 %v3750_v43 }
 0x15e   : > { %3257 = vmatprep.subr.mxu1 %v3763_v47  ;;  %3215 = vmatpush3.msra.mxu0 %v3750_v43 }
 0x15f   : > { %3258 = vmatpush3.msra.mxu1 %v3763_v47  ;;  %3216 = vmatprep.subr.mxu0 %v3759_v46 }
 0x160   : > { %3259 = vmatprep.subr.mxu1 %v3792_v57  ;;  %3217 = vmatpush3.msra.mxu0 %v3759_v46 }
 0x161   : > { %3260 = vmatpush3.msra.mxu1 %v3792_v57  ;;  %3218 = vmatprep.subr.mxu0 %v3780_v53 }
 0x162   : > { %3261 = vmatprep.subr.mxu1 %v3830_v8  ;;  %3219 = vmatpush3.msra.mxu0 %v3780_v53  ;;  %v1715_v53 = vld [vmem:[%s296_s11 + $0x8] sm:$0xff] }
 0x163   : > { %3262 = vmatpush3.msra.mxu1 %v3830_v8  ;;  %3220 = vmatprep.subr.mxu0 %v3801_v60 }
 0x164   : > { %3263 = vmatprep.subr.mxu1 %v3851_v31  ;;  %3221 = vmatpush3.msra.mxu0 %v3801_v60 }
 0x165   : > { %3264 = vmatpush3.msra.mxu1 %v3851_v31  ;;  %3222 = vmatprep.subr.mxu0 %v3824_v6 }
 0x166   : > { %3265 = vmatprep.subr.mxu1 %v3868_v41  ;;  %3223 = vmatpush3.msra.mxu0 %v3824_v6 }
 0x167   : > { %3266 = vmatpush3.msra.mxu1 %v3868_v41  ;;  %3224 = vmatprep.subr.mxu0 %v3847_v30 }
 0x168   : > { %3268 = vmatmul.mubr.f32.vlgmr.msra.gmra.mxu1 %v1103_v7  ;;  %3305 = vmatprep.subr.mxu1 %v3632_v3 }
 0x169   : > { %3225 = vmatpush3.msra.mxu0 %v3847_v30  ;;  %3306 = vmatpush3.msra.mxu1 %v3632_v3  ;;  %v4829_v3 = vld [vmem:[#allocation8_spill] sm:$0xff] }
 0x16a   : > { %3337 = vmatprep.mubr.f32.mxu1 %v4180_v50  ;;  %3226 = vmatprep.subr.mxu0 %v3871_v48 }
 0x16b   : > { %3307 = vmatprep.subr.mxu1 %v3634_v4  ;;  %3227 = vmatpush3.msra.mxu0 %v3871_v48 }
 0x16c   : > { %3308 = vmatpush3.msra.mxu1 %v3634_v4  ;;  %3228 = vmatprep.subr.mxu0 %v3887_v54  ;;  %v4830_v4 = vld [vmem:[#allocation10_spill] sm:$0xff] }
 0x16d   : > { %3309 = vmatprep.subr.mxu1 %v3636_v5  ;;  %3229 = vmatpush3.msra.mxu0 %v3887_v54 }
 0x16e   : > { %3310 = vmatpush3.msra.mxu1 %v3636_v5  ;;  %3230 = vmatprep.subr.mxu0 %v3901_v59  ;;  %v4831_v5 = vld [vmem:[#allocation12_spill] sm:$0xff] }
 0x16f   : > { %3311 = vmatprep.subr.mxu1 %v3647_v9  ;;  %3231 = vmatpush3.msra.mxu0 %v3901_v59 }
 0x170   : > { %3312 = vmatpush3.msra.mxu1 %v3647_v9  ;;  %3233 = vmatmul.mubr.f32.vlgmr.msra.gmra.mxu0 %v4178_v25  ;;  %v4832_v9 = vld [vmem:[#allocation14_spill] sm:$0xff]  ;;  %v4442_v25 = vand.u32 4294901760, %v1705_v2 }
 0x171   : > { %3270 = vmatprep.subr.mxu0 %v3683_v21  ;;  %3313 = vmatprep.subr.mxu1 %v3649_v10 }
 0x172   : > { %3271 = vmatpush3.msra.mxu0 %v3683_v21  ;;  %3302 = vmatprep.mubr.f32.mxu0 %v4180_v50  ;;  %v4334_v21 = vsub.f32 %v1713_v17, %v4328_v19  ;;  %v4455_v40 = vsub.f32 %v1705_v2, %v4442_v25 }
 0x173   : > { %3314 = vmatpush3.msra.mxu1 %v3649_v10  ;;  %3272 = vmatprep.subr.mxu0 %v3686_v22  ;;  %v4833_v10 = vld [vmem:[#allocation16_spill] sm:$0xff] }
 0x174   : > { %3315 = vmatprep.subr.mxu1 %v3651_v11  ;;  %3273 = vmatpush3.msra.mxu0 %v3686_v22  ;;  %v4336_v22 = vand.u32 4294901760, %v1712_v20 }
 0x175   : > { %3316 = vmatpush3.msra.mxu1 %v3651_v11  ;;  %3274 = vmatprep.subr.mxu0 %v3689_v23  ;;  %v4834_v11 = vld [vmem:[#allocation18_spill] sm:$0xff] }
 0x176   : > { %3317 = vmatprep.subr.mxu1 %v3666_v16  ;;  %3275 = vmatpush3.msra.mxu0 %v3689_v23  ;;  %v1711_v23 = vld [vmem:[%s4736_s3 + $0x68] sm:$0xff] }
 0x177   : > { %3318 = vmatpush3.msra.mxu1 %v3666_v16  ;;  %3276 = vmatprep.subr.mxu0 %v3698_v26  ;;  %v1716_v16 = vld [vmem:[%s4737_s4] sm:$0xf] }
 0x178   : > { %3319 = vmatprep.subr.mxu1 %v3691_v24  ;;  %3277 = vmatpush3.msra.mxu0 %v3698_v26  ;;  %v4347_v26 = vsub.f32 %v1712_v20, %v4336_v22 }
 0x179   : > { %3320 = vmatpush3.msra.mxu1 %v3691_v24  ;;  %3278 = vmatprep.subr.mxu0 %v3703_v28  ;;  %v4344_v24 = vand.u32 4294901760, %v4334_v21 }
 0x17a   : > { %3321 = vmatprep.subr.mxu1 %v3700_v27  ;;  %3279 = vmatpush3.msra.mxu0 %v3703_v28  ;;  %v1710_v28 = vld [vmem:[%s4736_s3 + $0x60] sm:$0xff]  ;;  %v4359_v33 = vand.u32 4294901760, %v4347_v26 }
 0x17b   : > { %3322 = vmatpush3.msra.mxu1 %v3700_v27  ;;  %3280 = vmatprep.subr.mxu0 %v3734_v39  ;;  %v4349_v27 = vand.u32 4294901760, %v1711_v23  ;;  %v1915_v29 = vsub.f32 %v4334_v21, %v4344_v24 }
 0x17c   : > { %3323 = vmatprep.subr.mxu1 %v3721_v34  ;;  %3281 = vmatpush3.msra.mxu0 %v3734_v39  ;;  %v4364_v39 = vand.u32 4294901760, %v1710_v28 }
 0x17d   : > { %3324 = vmatpush3.msra.mxu1 %v3721_v34  ;;  %3282 = vmatprep.subr.mxu0 %v3747_v42  ;;  %v4362_v34 = vsub.f32 %v1711_v23, %v4349_v27  ;;  %v1916_v43 = vand.u32 4294901760, %v1915_v29  ;;  %v1701_v23 = vld [vmem:[%s4736_s3 + $0x18] sm:$0xff]  ;;  %v1699_v29 = vld [vmem:[%s4736_s3 + $0x8] sm:$0xff] }
 0x17e   : > { %3325 = vmatprep.subr.mxu1 %v3756_v45  ;;  %3283 = vmatpush3.msra.mxu0 %v3747_v42  ;;  %v1709_v42 = vld [vmem:[%s4736_s3 + $0x58] sm:$0xff] }
 0x17f   : > { %3326 = vmatpush3.msra.mxu1 %v3756_v45  ;;  %3284 = vmatprep.subr.mxu0 %v3777_v52  ;;  %v1922_v45 = vsub.f32 %v4347_v26, %v4359_v33  ;;  %v4378_v46 = vand.u32 4294901760, %v4362_v34  ;;  %v4384_v54 = vand.u32 4294901760, %v1709_v42 }
 0x180   : > { %3327 = vmatprep.subr.mxu1 %v3763_v47  ;;  %3285 = vmatpush3.msra.mxu0 %v3777_v52  ;;  %v1714_v52 = vld [vmem:[%s296_s11] sm:$0xff] }
 0x181   : > { %3328 = vmatpush3.msra.mxu1 %v3763_v47  ;;  %3286 = vmatprep.subr.mxu0 %v4829_v3  ;;  %v4381_v47 = vsub.f32 %v1710_v28, %v4364_v39  ;;  %v1923_v60 = vand.u32 4294901760, %v1922_v45  ;;  %v1929_v6 = vsub.f32 %v4362_v34, %v4378_v46  ;;  %v1700_v28 = vld [vmem:[%s4736_s3 + $0x10] sm:$0xff] }
 0x182   : > { %3329 = vmatprep.subr.mxu1 %v3792_v57  ;;  %3287 = vmatpush3.msra.mxu0 %v4829_v3 }
 0x183   : > { %3330 = vmatpush3.msra.mxu1 %v3792_v57  ;;  %3288 = vmatprep.subr.mxu0 %v4830_v4  ;;  %v1708_v57 = vld [vmem:[%s4736_s3 + $0x50] sm:$0xff]  ;;  %v1930_v48 = vand.u32 4294901760, %v1929_v6  ;;  %v4516_v6 = vand.u32 4294901760, %v1699_v29 }
 0x184   : > { %3331 = vmatprep.subr.mxu1 %v3830_v8  ;;  %3289 = vmatpush3.msra.mxu0 %v4830_v4  ;;  %v4395_v30 = vand.u32 4294901760, %v1708_v57  ;;  %v1964_v4 = vsub.f32 %v4440_v61, %v4452_v13 }
 0x185   : > { %3332 = vmatpush3.msra.mxu1 %v3830_v8  ;;  %3290 = vmatprep.subr.mxu0 %v4831_v5  ;;  %v4393_v8 = vand.u32 4294901760, %v4381_v47  ;;  %v4534_v2 = vsub.f32 %v1699_v29, %v4516_v6 }
 0x186   : > { %3333 = vmatprep.subr.mxu1 %v3851_v31  ;;  %3291 = vmatpush3.msra.mxu0 %v4831_v5  ;;  %v4407_v36 = vsub.f32 %v1708_v57, %v4395_v30  ;;  %v4467_v5 = vand.u32 4294901760, %v4455_v40 }
 0x187   : > { %3334 = vmatpush3.msra.mxu1 %v3851_v31  ;;  %3292 = vmatprep.subr.mxu0 %v4832_v9  ;;  %v4398_v31 = vsub.f32 %v1709_v42, %v4384_v54  ;;  %v1936_v59 = vsub.f32 %v4381_v47, %v4393_v8 }
 0x188   : > { %3335 = vmatprep.subr.mxu1 %v3868_v41  ;;  %3293 = vmatpush3.msra.mxu0 %v4832_v9  ;;  %v4420_v55 = vand.u32 4294901760, %v4407_v36  ;;  %4838 = vst [vmem:[#allocation3_spill] sm:$0xff] %v4467_v5  ;;  %v4469_v9 = vand.u32 4294901760, %v1703_v62 }
 0x189   : > { %3336 = vmatpush3.msra.mxu1 %v3868_v41  ;;  %3294 = vmatprep.subr.mxu0 %v4833_v10  ;;  %v1707_v41 = vld [vmem:[%s4736_s3 + $0x48] sm:$0xff]  ;;  %v4413_v37 = vand.u32 4294901760, %v4398_v31  ;;  %v1937_v0 = vand.u32 4294901760, %v1936_v59 }
 0x18a   : > { %3338 = vmatmul.mubr.f32.vlgmr.msra.gmra.mxu1 %v4173_v38  ;;  %3295 = vmatpush3.msra.mxu0 %v4833_v10  ;;  %v4409_v32 = vand.u32 4294901760, %v1707_v41  ;;  %v1950_v56 = vsub.f32 %v4407_v36, %v4420_v55  ;;  %v4473_v10 = vsub.f32 %v1704_v49, %v4458_v51 }
 0x18b   : > { %3296 = vmatprep.subr.mxu0 %v4834_v11  ;;  %3345 = vmatprep.subr.mxu1 %v4328_v19  ;;  %v1943_v35 = vsub.f32 %v4398_v31, %v4413_v37 }
 0x18c   : > { %3297 = vmatpush3.msra.mxu0 %v4834_v11  ;;  %3346 = vmatpush3.msra.mxu1 %v4328_v19  ;;  %v4423_v63 = vsub.f32 %v1707_v41, %v4409_v32  ;;  %v1951_v7 = vand.u32 4294901760, %v1950_v56  ;;  %v1702_v11 = vld [vmem:[%s4736_s3 + $0x20] sm:$0xff]  ;;  %v4488_v20 = vand.u32 4294901760, %v4473_v10 }
 0x18d   : > { %3298 = vmatprep.subr.mxu0 %v4835_v14  ;;  %3347 = vmatprep.subr.mxu1 %v4336_v22  ;;  %v1944_v50 = vand.u32 4294901760, %v1943_v35  ;;  %v4484_v17 = vand.u32 4294901760, %v1702_v11 }
 0x18e   : > { %3299 = vmatpush3.msra.mxu0 %v4835_v14  ;;  %3348 = vmatpush3.msra.mxu1 %v4336_v22  ;;  %v1965_v14 = vand.u32 4294901760, %v1964_v4  ;;  %4839 = vst [vmem:[#allocation5_spill] sm:$0xff] %v4488_v20  ;;  %v1978_v57 = vsub.f32 %v4473_v10, %v4488_v20 }
 0x18f   : > { %3300 = vmatprep.subr.mxu0 %v4836_v15  ;;  %3349 = vmatprep.subr.mxu1 %v4349_v27  ;;  %v4504_v45 = vsub.f32 %v1702_v11, %v4484_v17 }
 0x190   : > { %3301 = vmatpush3.msra.mxu0 %v4836_v15  ;;  %3350 = vmatpush3.msra.mxu1 %v4349_v27  ;;  %v1971_v15 = vsub.f32 %v4455_v40, %v4467_v5 }
 0x191   : > { %3303 = vmatmul.mubr.f32.vlgmr.msra.gmra.mxu0 %v4173_v38  ;;  %3340 = vmatprep.subr.msk.mxu0 %vm1724_vm0, %v1716_v16  ;;  %v4437_v38 = vand.u32 4294901760, %v4423_v63  ;;  %v4524_v59 = vand.u32 4294901760, %v4504_v45 }
 0x192   : > { %3341 = vmatpush3.msk.msra.mxu0 %vm1724_vm0, %v1716_v16  ;;  %3351 = vmatprep.subr.mxu1 %v4364_v39  ;;  %v4482_v16 = vsub.f32 %v1703_v62, %v4469_v9  ;;  %v1972_v42 = vand.u32 4294901760, %v1971_v15  ;;  %v4550_v62 = vand.u32 4294901760, %v4534_v2 }
 0x193   : > { %3352 = vmatpush3.msra.mxu1 %v4364_v39  ;;  %3342 = vmatprep.mubr.msk.f32.mxu0 %vm1717_vm1, %v1714_v52  ;;  %v1957_v58 = vsub.f32 %v4423_v63, %v4437_v38  ;;  %v4506_v52 = vand.u32 4294901760, %v1701_v23  ;;  %4841 = vst [vmem:[#allocation9_spill] sm:$0xff] %v4524_v59  ;;  %v1992_v49 = vsub.f32 %v4504_v45, %v4524_v59 }
 0x194   : > { %3380 = vmatprep.subr.mxu0 %v1916_v43  ;;  %3353 = vmatprep.subr.mxu1 %v4384_v54  ;;  %4844 = vst [vmem:[#allocation15_spill] sm:$0xff] %v4550_v62  ;;  %v2013_v15 = vsub.f32 %v4534_v2, %v4550_v62 }
 0x195   : > { %3343 = vmatmul.mubr.msk.f32.vlgmr.msra.gmra.mxu0 %vm1717_vm1, %v1715_v53  ;;  %3354 = vmatpush3.msra.mxu1 %v4384_v54  ;;  %v1958_v3 = vand.u32 4294901760, %v1957_v58  ;;  %v1698_v53 = vld [vmem:[%s4736_s3] sm:$0xff]  ;;  %v4527_v18 = vsub.f32 %v1701_v23, %v4506_v52  ;;  %v1993_v4 = vand.u32 4294901760, %v1992_v49 }
 0x196   : > { %3381 = vmatpush3.msra.mxu0 %v1916_v43  ;;  %3355 = vmatprep.subr.mxu1 %v4395_v30  ;;  %v4501_v43 = vand.u32 4294901760, %v4482_v16  ;;  %v4519_v41 = vand.u32 4294901760, %v1698_v53 }
 0x197   : > { %3382 = vmatprep.subr.mxu0 %v1923_v60  ;;  %3356 = vmatpush3.msra.mxu1 %v4395_v30 }
 0x198   : > { %3383 = vmatpush3.msra.mxu0 %v1923_v60  ;;  %3357 = vmatprep.subr.mxu1 %v4409_v32  ;;  %4840 = vst [vmem:[#allocation7_spill] sm:$0xff] %v4501_v43  ;;  %v4514_v60 = vand.u32 4294901760, %v1700_v28  ;;  %v4537_v56 = vsub.f32 %v1698_v53, %v4519_v41 }
 0x199   : > { %3384 = vmatprep.subr.mxu0 %v1930_v48  ;;  %3358 = vmatpush3.msra.mxu1 %v4409_v32 }
 0x19a   : > { %3385 = vmatpush3.msra.mxu0 %v1930_v48  ;;  %3359 = vmatprep.subr.mxu1 %v4425_v12  ;;  %v1985_v48 = vsub.f32 %v4482_v16, %v4501_v43  ;;  %v4531_v35 = vsub.f32 %v1700_v28, %v4514_v60 }
 0x19b   : > { %3386 = vmatprep.subr.mxu0 %v1937_v0  ;;  %3360 = vmatpush3.msra.mxu1 %v4425_v12 }
 0x19c   : > { %3387 = vmatpush3.msra.mxu0 %v1937_v0  ;;  %3361 = vmatprep.subr.mxu1 %v4442_v25  ;;  %v1979_v0 = vand.u32 4294901760, %v1978_v57  ;;  %v4547_v58 = vand.u32 4294901760, %v4531_v35 }
 0x19d   : > { %3388 = vmatprep.subr.mxu0 %v1944_v50  ;;  %3362 = vmatpush3.msra.mxu1 %v4442_v25 }
 0x19e   : > { %3389 = vmatpush3.msra.mxu0 %v1944_v50  ;;  %3363 = vmatprep.subr.mxu1 %v4458_v51  ;;  %v1986_v50 = vand.u32 4294901760, %v1985_v48  ;;  %4843 = vst [vmem:[#allocation13_spill] sm:$0xff] %v4547_v58 }
 0x19f   : > { %3390 = vmatprep.subr.mxu0 %v1951_v7  ;;  %3364 = vmatpush3.msra.mxu1 %v4458_v51 }
 0x1a0   : > { %3391 = vmatpush3.msra.mxu0 %v1951_v7  ;;  %3365 = vmatprep.subr.mxu1 %v4469_v9  ;;  %v4543_v7 = vand.u32 4294901760, %v4527_v18 }
 0x1a1   : > { %3392 = vmatprep.subr.mxu0 %v1958_v3  ;;  %3366 = vmatpush3.msra.mxu1 %v4469_v9 }
 0x1a2   : > { %3393 = vmatpush3.msra.mxu0 %v1958_v3  ;;  %3367 = vmatprep.subr.mxu1 %v4484_v17  ;;  %4842 = vst [vmem:[#allocation11_spill] sm:$0xff] %v4543_v7  ;;  %v4553_v3 = vand.u32 4294901760, %v4537_v56  ;;  %v1999_v11 = vsub.f32 %v4527_v18, %v4543_v7 }
 0x1a3   : > { %3394 = vmatprep.subr.mxu0 %v1965_v14  ;;  %3368 = vmatpush3.msra.mxu1 %v4484_v17 }
 0x1a4   : > { %3395 = vmatpush3.msra.mxu0 %v1965_v14  ;;  %3369 = vmatprep.subr.mxu1 %v4506_v52  ;;  %4845 = vst [vmem:[#allocation17_spill] sm:$0xff] %v4553_v3  ;;  %v2006_v14 = vsub.f32 %v4531_v35, %v4547_v58  ;;  %v2000_v23 = vand.u32 4294901760, %v1999_v11  ;;  %v2020_v29 = vsub.f32 %v4537_v56, %v4553_v3 }
 0x1a5   : > { %3396 = vmatprep.subr.mxu0 %v1972_v42  ;;  %3370 = vmatpush3.msra.mxu1 %v4506_v52 }
 0x1a6   : > { %3397 = vmatpush3.msra.mxu0 %v1972_v42  ;;  %3371 = vmatprep.subr.mxu1 %v4514_v60  ;;  %v2007_v28 = vand.u32 4294901760, %v2006_v14  ;;  %v2014_v42 = vand.u32 4294901760, %v2013_v15  ;;  %v2021_v53 = vand.u32 4294901760, %v2020_v29 }
 0x1a7   : > { %3398 = vmatprep.subr.mxu0 %v1979_v0  ;;  %3372 = vmatpush3.msra.mxu1 %v4514_v60 }
 0x1a8   : > { %3399 = vmatpush3.msra.mxu0 %v1979_v0  ;;  %3373 = vmatprep.subr.mxu1 %v4516_v6 }
 0x1a9   : > { %3400 = vmatprep.subr.mxu0 %v1986_v50  ;;  %3374 = vmatpush3.msra.mxu1 %v4516_v6 }
 0x1aa   : > { %3401 = vmatpush3.msra.mxu0 %v1986_v50  ;;  %3375 = vmatprep.subr.mxu1 %v4519_v41 }
 0x1ab   : > { %3402 = vmatprep.subr.mxu0 %v1993_v4  ;;  %3376 = vmatpush3.msra.mxu1 %v4519_v41 }
 0x1ac   : > { %3403 = vmatpush3.msra.mxu0 %v1993_v4  ;;  %3415 = vmatprep.subr.mxu1 %v4334_v21 }
 0x1ad   : > { %3404 = vmatprep.subr.mxu0 %v2000_v23 }
 0x1ae   : > { %3405 = vmatpush3.msra.mxu0 %v2000_v23 }
 0x1af   : > { %3406 = vmatprep.subr.mxu0 %v2007_v28 }
 0x1b0   : > { %3407 = vmatpush3.msra.mxu0 %v2007_v28 }
 0x1b1   : > { %3408 = vmatprep.subr.mxu0 %v2014_v42 }
 0x1b2   : > { %3409 = vmatpush3.msra.mxu0 %v2014_v42 }
 0x1b3   : > { %3410 = vmatprep.subr.mxu0 %v2021_v53 }
 0x1b4   : > { %3411 = vmatpush3.msra.mxu0 %v2021_v53 }
 0x1b5   : > { %3450 = vmatprep.subr.mxu0 %v4328_v19 }
 0x207   : > { %v3199_v48 = vpop.f32.mrf.mxu1 }
 0x209   : > { %v1258_v11 = vpop.f32.mrf.mxu1 }
 0x20f   : > { %v3164_v57 = vpop.f32.mrf.mxu0 }
 0x210   : > { %v1108_v50 = vadd.f32 1e-05, %v3164_v57 }
 0x211   : > { %v1097_v0 = vpop.f32.mrf.mxu0 }
 0x212   : > { %v1098_v4 = vadd.f32 1e-05, %v1097_v0  ;;  %v1265_v14 = vadd.f32 %v3199_v48, %v1108_v50 }
 0x214   : > { %v1259_v62 = vadd.f32 %v1258_v11, %v1098_v4 }
 0x228   : > { %v3269_v15 = vpop.f32.mrf.mxu1 }
 0x22a   : > { %v1464_v28 = vpop.f32.mrf.mxu1 }
 0x230   : > { %v3234_v49 = vpop.f32.mrf.mxu0 }
 0x231   : > { %v1376_v23 = vadd.f32 %v3234_v49, %v1265_v14 }
 0x232   : > { %v1368_v3 = vpop.f32.mrf.mxu0 }
 0x233   : > { %v1369_v29 = vadd.f32 %v1368_v3, %v1259_v62  ;;  %v1473_v58 = vadd.f32 %v3269_v15, %v1376_v23 }
 0x235   : > { %v1465_v59 = vadd.f32 %v1464_v28, %v1369_v29 }
 0x24a   : > { %v3339_v42 = vpop.f32.mrf.mxu1 }
 0x24c   : > { %v1684_v13 = vpop.f32.mrf.mxu1 }
 0x251   : > { %v3304_v7 = vpop.f32.mrf.mxu0 }
 0x252   : > { %v1598_v53 = vadd.f32 %v3304_v7, %v1473_v58 }
 0x253   : > { %v1591_v43 = vpop.f32.mrf.mxu0 }
 0x254   : > { %v1691_v20 = vadd.f32 %v3339_v42, %v1598_v53  ;;  %v1592_v5 = vadd.f32 %v1591_v43, %v1465_v59 }
 0x256   : > { %3563 = vrsqrt.f32 %v1691_v20  ;;  %v1685_v57 = vadd.f32 %v1684_v13, %v1592_v5 }
 0x258   : > { %3565 = vrsqrt.f32 %v1685_v57 }
 0x263   : > { %v3564_v0 = vpop.eup %3563 }
 0x264   : > { %v1697_v48 = vmul.f32 %v3564_v0, %v4166_v1 }
 0x265   : > { %v3566_v50 = vpop.eup %3565 }
 0x266   : > { %v1696_v49 = vmul.f32 %v3566_v50, %v4171_v44  ;;  %v4573_v62 = vand.u32 4294901760, %v1697_v48 }
 0x268   : > { %v4575_v3 = vand.u32 4294901760, %v1696_v49  ;;  %v4578_v7 = vsub.f32 %v1697_v48, %v4573_v62 }
 0x26a   : > { %3412 = vmatprep.mubr.f32.mxu0 %v4575_v3  ;;  %v1892_v43 = vsub.f32 %v1696_v49, %v4575_v3  ;;  %v1903_v13 = vand.u32 4294901760, %v4578_v7 }
 0x26b   : > { %3413 = vmatmul.mubr.f32.vlgmr.msra.gmra.mxu0 %v4573_v62 }
 0x26c   : > { %3451 = vmatpush3.msra.mxu0 %v4328_v19  ;;  %v1893_v1 = vand.u32 4294901760, %v1892_v43  ;;  %v1904_v44 = vsub.f32 %v4578_v7, %v1903_v13 }
 0x26d   : > { %3452 = vmatprep.subr.mxu0 %v4336_v22 }
 0x26e   : > { %3453 = vmatpush3.msra.mxu0 %v4336_v22  ;;  %3482 = vmatprep.mubr.f32.mxu0 %v1893_v1  ;;  %v1894_v5 = vsub.f32 %v1892_v43, %v1893_v1  ;;  %v1905_v59 = vand.u32 4294901760, %v1904_v44 }
 0x26f   : > { %3454 = vmatprep.subr.mxu0 %v4349_v27 }
 0x270   : > { %3455 = vmatpush3.msra.mxu0 %v4349_v27  ;;  %v1895_v20 = vand.u32 4294901760, %v1894_v5 }
 0x271   : > { %3456 = vmatprep.subr.mxu0 %v4364_v39 }
 0x272   : > { %3457 = vmatpush3.msra.mxu0 %v4364_v39  ;;  %3377 = vmatprep.mubr.f32.mxu1 %v1895_v20 }
 0x273   : > { %3458 = vmatprep.subr.mxu0 %v4384_v54  ;;  %3378 = vmatmul.mubr.f32.vlgmr.msra.gmra.mxu1 %v1905_v59 }
 0x274   : > { %3416 = vmatpush3.msra.mxu1 %v4334_v21  ;;  %3459 = vmatpush3.msra.mxu0 %v4384_v54  ;;  %v4847_v21 = vld [vmem:[#allocation3_spill] sm:$0xff] }
 0x275   : > { %3417 = vmatprep.subr.mxu1 %v4347_v26  ;;  %3447 = vmatprep.mubr.f32.mxu1 %v1892_v43 }
 0x276   : > { %3460 = vmatprep.subr.mxu0 %v4395_v30  ;;  %3418 = vmatpush3.msra.mxu1 %v4347_v26  ;;  %v4850_v26 = vld [vmem:[#allocation9_spill] sm:$0xff] }
 0x277   : > { %3461 = vmatpush3.msra.mxu0 %v4395_v30  ;;  %3419 = vmatprep.subr.mxu1 %v4362_v34 }
 0x278   : > { %3462 = vmatprep.subr.mxu0 %v4409_v32  ;;  %3420 = vmatpush3.msra.mxu1 %v4362_v34  ;;  %v4853_v34 = vld [vmem:[#allocation15_spill] sm:$0xff] }
 0x279   : > { %3463 = vmatpush3.msra.mxu0 %v4409_v32  ;;  %3421 = vmatprep.subr.mxu1 %v4381_v47 }
 0x27a   : > { %3464 = vmatprep.subr.mxu0 %v4425_v12  ;;  %3422 = vmatpush3.msra.mxu1 %v4381_v47 }
 0x27b   : > { %3465 = vmatpush3.msra.mxu0 %v4425_v12  ;;  %3423 = vmatprep.subr.mxu1 %v4398_v31 }
 0x27c   : > { %3466 = vmatprep.subr.mxu0 %v4442_v25  ;;  %3424 = vmatpush3.msra.mxu1 %v4398_v31 }
 0x27d   : > { %3467 = vmatpush3.msra.mxu0 %v4442_v25  ;;  %3425 = vmatprep.subr.mxu1 %v4407_v36 }
 0x27e   : > { %3468 = vmatprep.subr.mxu0 %v4458_v51  ;;  %3426 = vmatpush3.msra.mxu1 %v4407_v36 }
 0x27f   : > { %3469 = vmatpush3.msra.mxu0 %v4458_v51  ;;  %3427 = vmatprep.subr.mxu1 %v4423_v63 }
 0x280   : > { %3470 = vmatprep.subr.mxu0 %v4469_v9  ;;  %3428 = vmatpush3.msra.mxu1 %v4423_v63 }
 0x281   : > { %3471 = vmatpush3.msra.mxu0 %v4469_v9  ;;  %3429 = vmatprep.subr.mxu1 %v4440_v61 }
 0x282   : > { %3472 = vmatprep.subr.mxu0 %v4484_v17  ;;  %3430 = vmatpush3.msra.mxu1 %v4440_v61 }
 0x283   : > { %3473 = vmatpush3.msra.mxu0 %v4484_v17  ;;  %3431 = vmatprep.subr.mxu1 %v4455_v40 }
 0x284   : > { %3474 = vmatprep.subr.mxu0 %v4506_v52  ;;  %3432 = vmatpush3.msra.mxu1 %v4455_v40 }
 0x285   : > { %3475 = vmatpush3.msra.mxu0 %v4506_v52  ;;  %3433 = vmatprep.subr.mxu1 %v4473_v10 }
 0x286   : > { %3476 = vmatprep.subr.mxu0 %v4514_v60  ;;  %3434 = vmatpush3.msra.mxu1 %v4473_v10 }
 0x287   : > { %3477 = vmatpush3.msra.mxu0 %v4514_v60  ;;  %3435 = vmatprep.subr.mxu1 %v4482_v16 }
 0x288   : > { %3478 = vmatprep.subr.mxu0 %v4516_v6  ;;  %3436 = vmatpush3.msra.mxu1 %v4482_v16 }
 0x289   : > { %3479 = vmatpush3.msra.mxu0 %v4516_v6  ;;  %3437 = vmatprep.subr.mxu1 %v4504_v45 }
 0x28a   : > { %3480 = vmatprep.subr.mxu0 %v4519_v41  ;;  %3438 = vmatpush3.msra.mxu1 %v4504_v45 }
 0x28b   : > { %3481 = vmatpush3.msra.mxu0 %v4519_v41  ;;  %3439 = vmatprep.subr.mxu1 %v4527_v18 }
 0x28c   : > { %3483 = vmatmul.mubr.f32.vlgmr.msra.gmra.mxu0 %v1903_v13  ;;  %3520 = vmatprep.subr.mxu0 %v4328_v19 }
 0x28d   : > { %3440 = vmatpush3.msra.mxu1 %v4527_v18  ;;  %3521 = vmatpush3.msra.mxu0 %v4328_v19  ;;  %v4846_v19 = vld [vmem:[#allocation2_spill] sm:$0xff] }
 0x28e   : > { %3552 = vmatprep.mubr.f32.mxu0 %v4575_v3  ;;  %3441 = vmatprep.subr.mxu1 %v4531_v35 }
 0x28f   : > { %3522 = vmatprep.subr.mxu0 %v4336_v22  ;;  %3442 = vmatpush3.msra.mxu1 %v4531_v35 }
 0x290   : > { %3523 = vmatpush3.msra.mxu0 %v4336_v22  ;;  %3443 = vmatprep.subr.mxu1 %v4534_v2  ;;  %v4848_v22 = vld [vmem:[#allocation5_spill] sm:$0xff] }
 0x291   : > { %3524 = vmatprep.subr.mxu0 %v4349_v27  ;;  %3444 = vmatpush3.msra.mxu1 %v4534_v2  ;;  %v2590_v2 = vld [vmem:[%s4739_s6] ss:$0 sm:$0xff] }
 0x292   : > { %3525 = vmatpush3.msra.mxu0 %v4349_v27  ;;  %3445 = vmatprep.subr.mxu1 %v4537_v56  ;;  %v4851_v27 = vld [vmem:[#allocation11_spill] sm:$0xff] }
 0x293   : > { %3526 = vmatprep.subr.mxu0 %v4364_v39  ;;  %3446 = vmatpush3.msra.mxu1 %v4537_v56 }
 0x294   : > { %3527 = vmatpush3.msra.mxu0 %v4364_v39  ;;  %3448 = vmatmul.mubr.f32.vlgmr.msra.gmra.mxu1 %v4578_v7  ;;  %v4854_v39 = vld [vmem:[#allocation17_spill] sm:$0xff] }
 0x295   : > { %3485 = vmatprep.subr.mxu1 %v4344_v24  ;;  %3528 = vmatprep.subr.mxu0 %v4384_v54 }
 0x296   : > { %3486 = vmatpush3.msra.mxu1 %v4344_v24  ;;  %3517 = vmatprep.mubr.f32.mxu1 %v4575_v3  ;;  %v4849_v24 = vld [vmem:[#allocation7_spill] sm:$0xff] }
 0x297   : > { %3529 = vmatpush3.msra.mxu0 %v4384_v54  ;;  %3487 = vmatprep.subr.mxu1 %v4359_v33 }
 0x298   : > { %3530 = vmatprep.subr.mxu0 %v4395_v30  ;;  %3488 = vmatpush3.msra.mxu1 %v4359_v33  ;;  %v4852_v33 = vld [vmem:[#allocation13_spill] sm:$0xff] }
 0x299   : > { %3531 = vmatpush3.msra.mxu0 %v4395_v30  ;;  %3489 = vmatprep.subr.mxu1 %v4378_v46 }
 0x29a   : > { %3532 = vmatprep.subr.mxu0 %v4409_v32  ;;  %3490 = vmatpush3.msra.mxu1 %v4378_v46  ;;  %v3344_v46 = vpop.f32.mrf.mxu0 }
 0x29b   : > { %3533 = vmatpush3.msra.mxu0 %v4409_v32  ;;  %3491 = vmatprep.subr.mxu1 %v4393_v8 }
 0x29c   : > { %3534 = vmatprep.subr.mxu0 %v4425_v12  ;;  %3492 = vmatpush3.msra.mxu1 %v4393_v8  ;;  %v1794_v54 = vpop.f32.mrf.mxu0  ;;  %v2589_v8 = vld [vmem:[%s4738_s5] ss:$0 sm:$0xff] }
 0x29d   : > { %3535 = vmatpush3.msra.mxu0 %v4425_v12  ;;  %3493 = vmatprep.subr.mxu1 %v4413_v37 }
 0x29e   : > { %3536 = vmatprep.subr.mxu0 %v4442_v25  ;;  %3494 = vmatpush3.msra.mxu1 %v4413_v37 }
 0x29f   : > { %3537 = vmatpush3.msra.mxu0 %v4442_v25  ;;  %3495 = vmatprep.subr.mxu1 %v4420_v55 }
 0x2a0   : > { %3538 = vmatprep.subr.mxu0 %v4458_v51  ;;  %3496 = vmatpush3.msra.mxu1 %v4420_v55 }
 0x2a1   : > { %3539 = vmatpush3.msra.mxu0 %v4458_v51  ;;  %3497 = vmatprep.subr.mxu1 %v4437_v38 }
 0x2a2   : > { %3540 = vmatprep.subr.mxu0 %v4469_v9  ;;  %3498 = vmatpush3.msra.mxu1 %v4437_v38 }
 0x2a3   : > { %3541 = vmatpush3.msra.mxu0 %v4469_v9  ;;  %3499 = vmatprep.subr.mxu1 %v4846_v19 }
 0x2a4   : > { %3542 = vmatprep.subr.mxu0 %v4484_v17  ;;  %3500 = vmatpush3.msra.mxu1 %v4846_v19 }
 0x2a5   : > { %3543 = vmatpush3.msra.mxu0 %v4484_v17  ;;  %3501 = vmatprep.subr.mxu1 %v4847_v21 }
 0x2a6   : > { %3544 = vmatprep.subr.mxu0 %v4506_v52  ;;  %3502 = vmatpush3.msra.mxu1 %v4847_v21 }
 0x2a7   : > { %3545 = vmatpush3.msra.mxu0 %v4506_v52  ;;  %3503 = vmatprep.subr.mxu1 %v4848_v22 }
 0x2a8   : > { %3546 = vmatprep.subr.mxu0 %v4514_v60  ;;  %3504 = vmatpush3.msra.mxu1 %v4848_v22 }
 0x2a9   : > { %3547 = vmatpush3.msra.mxu0 %v4514_v60  ;;  %3505 = vmatprep.subr.mxu1 %v4849_v24 }
 0x2aa   : > { %3548 = vmatprep.subr.mxu0 %v4516_v6  ;;  %3506 = vmatpush3.msra.mxu1 %v4849_v24 }
 0x2ab   : > { %3549 = vmatpush3.msra.mxu0 %v4516_v6  ;;  %3507 = vmatprep.subr.mxu1 %v4850_v26 }
 0x2ac   : > { %3550 = vmatprep.subr.mxu0 %v4519_v41  ;;  %3508 = vmatpush3.msra.mxu1 %v4850_v26 }
 0x2ad   : > { %3551 = vmatpush3.msra.mxu0 %v4519_v41  ;;  %3509 = vmatprep.subr.mxu1 %v4851_v27 }
 0x2ae   : > { %3553 = vmatmul.mubr.f32.vlgmr.msra.gmra.mxu0 %v4573_v62  ;;  %3510 = vmatpush3.msra.mxu1 %v4851_v27 }
 0x2af   : > { %3511 = vmatprep.subr.mxu1 %v4852_v33 }
 0x2b0   : > { %3512 = vmatpush3.msra.mxu1 %v4852_v33 }
 0x2b1   : > { %3513 = vmatprep.subr.mxu1 %v4853_v34 }
 0x2b2   : > { %3514 = vmatpush3.msra.mxu1 %v4853_v34 }
 0x2b3   : > { %3515 = vmatprep.subr.mxu1 %v4854_v39 }
 0x2b4   : > { %3516 = vmatpush3.msra.mxu1 %v4854_v39 }
 0x2b5   : > { %3518 = vmatmul.mubr.f32.vlgmr.msra.gmra.mxu1 %v4573_v62 }
 0x32b   : > { %v3414_v30 = vpop.f32.mrf.mxu0 }
 0x32d   : > { %v2058_v55 = vpop.f32.mrf.mxu0 }
 0x333   : > { %v3379_v47 = vpop.f32.mrf.mxu1 }
 0x334   : > { %v1908_v36 = vadd.f32 %v3379_v47, %v2589_v8 }
 0x335   : > { %v1897_v31 = vpop.f32.mrf.mxu1 }
 0x336   : > { %v1898_v37 = vadd.f32 %v2589_v8, %v1897_v31  ;;  %v2065_v63 = vadd.f32 %v3414_v30, %v1908_v36 }
 0x338   : > { %v2059_v25 = vadd.f32 %v2058_v55, %v1898_v37 }
 0x34c   : > { %v3484_v12 = vpop.f32.mrf.mxu0 }
 0x34e   : > { %v2264_v51 = vpop.f32.mrf.mxu0 }
 0x354   : > { %v3449_v32 = vpop.f32.mrf.mxu1 }
 0x355   : > { %v2176_v61 = vadd.f32 %v3449_v32, %v2065_v63 }
 0x356   : > { %v2168_v38 = vpop.f32.mrf.mxu1 }
 0x357   : > { %v2169_v40 = vadd.f32 %v2168_v38, %v2059_v25  ;;  %v2273_v9 = vadd.f32 %v3484_v12, %v2176_v61 }
 0x359   : > { %v2265_v45 = vadd.f32 %v2264_v51, %v2169_v40 }
 0x36e   : > { %v3554_v10 = vpop.f32.mrf.mxu0 }
 0x370   : > { %v2484_v41 = vpop.f32.mrf.mxu0 }
 0x375   : > { %v3519_v16 = vpop.f32.mrf.mxu1 }
 0x376   : > { %v2398_v17 = vadd.f32 %v3519_v16, %v2273_v9 }
 0x377   : > { %v2391_v52 = vpop.f32.mrf.mxu1 }
 0x378   : > { %v2491_v60 = vadd.f32 %v3554_v10, %v2398_v17  ;;  %v2392_v6 = vadd.f32 %v2391_v52, %v2265_v45 }
 0x37a   : > { %v2485_v18 = vadd.f32 %v2484_v41, %v2392_v6  ;;  %v2495_v35 = vmul.f32 %v3344_v46, %v2491_v60 }
 0x37c   : > { %v2494_v56 = vmul.f32 %v2485_v18, %v1794_v54  ;;  %v2504_v4 = vadd.f32 %v2590_v2, %v2495_v35 }
 0x37e   : > { %v2503_v58 = vadd.f32 %v2590_v2, %v2494_v56  ;;  %2506 = vst [vmem:[%s302_s19 + $0x8] sm:$0xff] %v2504_v4 }
 0x380   : > { %2505 = vst [vmem:[%s302_s19] sm:$0xff] %v2503_v58 }
 0x381 PF: > { %s17_s24 = sadd.s32 1, %s3573_s24  }
 0x382   : > { %p14_p4 = scmp.ge.s32.totalorder %s17_s24, 6  }
 0x384   :  { %16 = sbr.rel (!%p14_p4) target bundleno = 1 (0x1), region = 81 }

</bundles_post_ra>
